<compile_context>
chip_gen: v7x
topology: tpu7x:2x2x1
jax: 0.10.0
libtpu: 0.0.40
codegen_flags: <defaults>
</compile_context>

<pallas_src>
import jax
import jax.numpy as jnp
from jax import lax
from jax.experimental import pallas as pl
from jax.experimental.pallas import tpu as pltpu

EPS = 1e-3
DILATIONS = (1, 2, 4, 8, 16)


def _rup(v, m):
    return ((v + m - 1) // m) * m


def downsampler_b_forward(x_nchw, wc1, wd_list, gamma, beta):
    """DownSamplerB forward.  wd_list = [w_d1, w_d2, w_d4, w_d8, w_d16] (OIHW)."""
    N, Cin, H, W = x_nchw.shape
    n = wc1.shape[0]
    n1 = wd_list[0].shape[0]
    Cout = n1 + 4 * n

    Ho = (H + 2 - 3) // 2 + 1
    Wo = (W + 2 - 3) // 2 + 1
    HW = Ho * Wo

    # n_p rounded to 16 keeps every bf16 slab write 16-sublane aligned.
    n_p = _rup(n, 16)
    K1 = _rup(9 * Cin, 8)          # densely packed stride-2 im2col depth
    KD = 45 * n_p                  # fused dilated-stage contraction depth
    DMAX = max(DILATIONS)
    OFF = DMAX * Wo + DMAX         # max |flattened shift| of any dilated tap
    LP = 2 * OFF + HW              # lane extent of the padded x1 scratch

    # ---------------- wrapper-side layout glue (tiny, no heavy compute) -----
    xf = x_nchw.astype(jnp.float32)
    xpad = jnp.pad(xf, ((0, 0), (0, 0), (1, 1), (1, 1)))
    taps = []
    for i in range(3):
        for j in range(3):
            taps.append(xpad[:, :, i:i + 2 * Ho - 1:2, j:j + 2 * Wo - 1:2])
    # channel-major patches: row index = tap*Cin + ic, lane index = y*Wo + x.
    p1 = jnp.stack(taps, axis=1).reshape(N, 9 * Cin, HW)
    p1 = jnp.pad(p1, ((0, 0), (0, K1 - 9 * Cin), (0, 0))).astype(jnp.bfloat16)

    # stride-2 conv weight: OIHW -> (tap*Cin, n) -> transposed (n_p, K1).
    w1 = jnp.transpose(wc1, (2, 3, 1, 0)).reshape(9 * Cin, n)
    w1 = jnp.pad(w1, ((0, K1 - 9 * Cin), (0, n_p - n)))
    w1t = jnp.transpose(w1).astype(jnp.bfloat16)                   # (n_p, K1)

    # Fused dilated-stage weight (Cout, 45*n_p): the channel concat and the
    # prefix sums are folded in by replicating each conv's weight into every
    # output group it feeds.  Row order matches the in-kernel slab layout
    # (tap-major, input-channel-minor).
    starts = (0, n1, n1 + n, n1 + 2 * n, n1 + 3 * n)
    recv = ((0,), (1, 2, 3, 4), (2, 3, 4), (3, 4), (4,))
    wdm = jnp.zeros((5, 3, 3, n_p, Cout), jnp.float32)
    for c, (w, groups) in enumerate(zip(wd_list, recv)):
        oc = w.shape[0]
        wt = jnp.transpose(w, (2, 3, 1, 0))                        # (3,3,n,oc)
        for g in groups:
            wdm = wdm.at[c, :, :, :n, starts[g]:starts[g] + oc].set(wt)
    wdt = jnp.transpose(wdm.reshape(KD, Cout)).astype(jnp.bfloat16)  # (Cout,KD)

    # Tiny lane-dense helper row: x-coordinate of each flattened position
    # (vector integer mod has no reliable in-kernel lowering; row masks need
    #  no division and are built from an iota inside the kernel).
    xcol = (jnp.arange(HW, dtype=jnp.int32) % Wo).reshape(1, HW)

    # ---------------- phase 1: convs + combine + per-batch BN stats ---------
    def conv_kernel(p1_ref, xcol_ref, w1_ref, wd_ref, comb_ref, stats_ref,
                    x1pad, slab):
        # stride-2 3x3 conv: one bf16 matmul, f32 accumulation on the MXU.
        x1t = jnp.dot(w1_ref[...], p1_ref[0],
                      preferred_element_type=jnp.float32)           # (n_p, HW)

        # Park x1 in a lane-padded scratch so every dilated tap is a static
        # lane slice.  Only the pad regions are re-zeroed; the interior is
        # fully overwritten every grid step (scratch is per-core under
        # "parallel", so no program_id guard).
        x1pad[:, 0:OFF] = jnp.zeros((n_p, OFF), jnp.bfloat16)
        x1pad[:, OFF + HW:LP] = jnp.zeros((n_p, OFF), jnp.bfloat16)
        x1pad[:, OFF:OFF + HW] = x1t.astype(jnp.bfloat16)

        # Boundary masks, one per distinct shift, hoisted out of the tap loop.
        # Row validity compares the flattened position against multiples of Wo.
        pp = lax.broadcasted_iota(jnp.int32, (1, HW), 1)
        xx = xcol_ref[...]
        row_ok = {}
        col_ok = {}
        for r in DILATIONS:
            for s in (-r, r):
                row_ok[s] = jnp.logical_and(pp >= -s * Wo, pp < (Ho - s) * Wo)
                col_ok[s] = jnp.logical_and(xx >= -s, xx < Wo - s)

        # Gather the 45 shifted taps into one (45*n_p, HW) bf16 slab.
        for c, r in enumerate(DILATIONS):
            for ty in (-1, 0, 1):
                sy = ty * r
                for tx in (-1, 0, 1):
                    sx = tx * r
                    k = sy * Wo + sx
                    piece = x1pad[:, OFF + k:OFF + k + HW]          # (n_p, HW)
                    if sy != 0 and sx != 0:
                        ok = jnp.logical_and(row_ok[sy], col_ok[sx])
                    elif sy != 0:
                        ok = row_ok[sy]
                    elif sx != 0:
                        ok = col_ok[sx]
                    else:
                        ok = None
                    if ok is not None:
                        piece = jnp.where(ok, piece, jnp.zeros_like(piece))
                    t = c * 9 + (ty + 1) * 3 + (tx + 1)
                    slab[t * n_p:(t + 1) * n_p, :] = piece

        # Single wide-K MXU matmul: all five dilated convs, the channel concat
        # and the prefix sums in one shot.  acc is (Cout, HW) f32.
        acc = jnp.dot(wd_ref[...], slab[...],
                      preferred_element_type=jnp.float32)

        comb_ref[0] = acc.astype(jnp.bfloat16)
        stats_ref[0, :, 0:1] = jnp.sum(acc, axis=1, keepdims=True)
        stats_ref[0, :, 1:2] = jnp.sum(acc * acc, axis=1, keepdims=True)

    comb, stats = pl.pallas_call(
        conv_kernel,
        out_shape=(jax.ShapeDtypeStruct((N, Cout, HW), jnp.bfloat16),
                   jax.ShapeDtypeStruct((N, Cout, 2), jnp.float32)),
        grid=(N,),
        in_specs=[
            pl.BlockSpec((1, K1, HW), lambda i: (i, 0, 0)),
            pl.BlockSpec((1, HW), lambda i: (0, 0)),
            pl.BlockSpec((n_p, K1), lambda i: (0, 0)),
            pl.BlockSpec((Cout, KD), lambda i: (0, 0)),
        ],
        out_specs=(
            pl.BlockSpec((1, Cout, HW), lambda i: (i, 0, 0)),
            pl.BlockSpec((1, Cout, 2), lambda i: (i, 0, 0)),
        ),
        scratch_shapes=[pltpu.VMEM((n_p, LP), jnp.bfloat16),
                        pltpu.VMEM((KD, HW), jnp.bfloat16)],
        compiler_params=pltpu.CompilerParams(
            dimension_semantics=("parallel",),
            vmem_limit_bytes=48 * 1024 * 1024),
    )(p1, xcol, w1t, wdt)

    # ---------------- BN statistics -> per-channel scale / shift ------------
    M = N * HW
    tot = jnp.sum(stats, axis=0)                                    # (Cout, 2)
    mean = tot[:, 0] / M
    var = jnp.maximum(tot[:, 1] / M - mean * mean, 0.0)             # biased
    scale = gamma.astype(jnp.float32) * lax.rsqrt(var + EPS)
    shift = beta.astype(jnp.float32) - mean * scale
    scale = scale.reshape(Cout, 1)
    shift = shift.reshape(Cout, 1)

    # ---------------- phase 2: lane-dense BN application --------------------
    def bn_kernel(y_ref, sc_ref, sh_ref, o_ref):
        o_ref[...] = y_ref[...].astype(jnp.float32) * sc_ref[...] + sh_ref[...]

    TL = HW                            # fixed lane tile, fall back to full HW
    for t in (512, 256, 128):
        if HW % t == 0:
            TL = t
            break

    out_flat = pl.pallas_call(
        bn_kernel,
        out_shape=jax.ShapeDtypeStruct((N, Cout, HW), jnp.float32),
        grid=(N, HW // TL),
        in_specs=[
            pl.BlockSpec((1, Cout, TL), lambda i, j: (i, 0, j)),
            pl.BlockSpec((Cout, 1), lambda i, j: (0, 0)),
            pl.BlockSpec((Cout, 1), lambda i, j: (0, 0)),
        ],
        out_specs=pl.BlockSpec((1, Cout, TL), lambda i, j: (i, 0, j)),
        compiler_params=pltpu.CompilerParams(
            dimension_semantics=("parallel", "parallel")),
    )(comb, scale, shift)

    # Channel-major throughout -> final NCHW is a pure reshape (no transpose).
    return out_flat.reshape(N, Cout, Ho, Wo)


def _reference(x, wc1, wd_list, gamma, beta):
    """Pure-JAX reference (conv inputs bf16-quantized like the kernel; BN f32)."""
    bf = lambda a: a.astype(jnp.bfloat16).astype(jnp.float32)

    def conv(inp, w, stride=1, dil=1):
        pad = dil  # k=3 -> ((3-1)//2)*dil
        return lax.conv_general_dilated(
            bf(inp), bf(w), (stride, stride), [(pad, pad), (pad, pad)],
            rhs_dilation=(dil, dil),
            dimension_numbers=("NCHW", "OIHW", "NCHW"),
            precision=lax.Precision.HIGHEST)

    x1 = conv(x, wc1, stride=2, dil=1)
    d1 = conv(x1, wd_list[0], dil=1)
    d2 = conv(x1, wd_list[1], dil=2)
    d4 = conv(x1, wd_list[2], dil=4)
    d8 = conv(x1, wd_list[3], dil=8)
    d16 = conv(x1, wd_list[4], dil=16)
    add2 = d2 + d4
    add3 = add2 + d8
    add4 = add3 + d16
    comb = jnp.concatenate([d1, d2, add2, add3, add4], axis=1)
    mean = jnp.mean(comb, axis=(0, 2, 3), keepdims=True)
    var = jnp.mean(jnp.square(comb - mean), axis=(0, 2, 3), keepdims=True)
    g = gamma.reshape(1, -1, 1, 1)
    b = beta.reshape(1, -1, 1, 1)
    # PReLU intentionally not applied: the original forward discards it.
    return (comb - mean) * lax.rsqrt(var + EPS) * g + b


if __name__ == "__main__":
    key = jax.random.PRNGKey(0)
    ks = jax.random.split(key, 9)

    N, Cin, H, W = 2, 4, 16, 16
    Cout = 20
    n = Cout // 5
    n1 = Cout - 4 * n

    x = jax.random.normal(ks[0], (N, Cin, H, W), dtype=jnp.float32)
    wc1 = 0.1 * jax.random.normal(ks[1], (n, Cin, 3, 3), dtype=jnp.float32)
    wd1 = 0.1 * jax.random.normal(ks[2], (n1, n, 3, 3), dtype=jnp.float32)
    wd2 = 0.1 * jax.random.normal(ks[3], (n, n, 3, 3), dtype=jnp.float32)
    wd4 = 0.1 * jax.random.normal(ks[4], (n, n, 3, 3), dtype=jnp.float32)
    wd8 = 0.1 * jax.random.normal(ks[5], (n, n, 3, 3), dtype=jnp.float32)
    wd16 = 0.1 * jax.random.normal(ks[6], (n, n, 3, 3), dtype=jnp.float32)
    gamma = 1.0 + 0.1 * jax.random.normal(ks[7], (Cout,), dtype=jnp.float32)
    beta = 0.1 * jax.random.normal(ks[8], (Cout,), dtype=jnp.float32)

    wd_list = [wd1, wd2, wd4, wd8, wd16]

    out = jax.jit(downsampler_b_forward)(x, wc1, wd_list, gamma, beta)
    out = jax.block_until_ready(out)

    ref = jax.block_until_ready(_reference(x, wc1, wd_list, gamma, beta))

    assert out.shape == (N, Cout, H // 2, W // 2), out.shape
    assert bool(jnp.all(jnp.isfinite(out)))
    max_err = float(jnp.max(jnp.abs(out - ref)))
    mean_err = float(jnp.mean(jnp.abs(out - ref)))
    # comb is stored in bf16 between the two passes (perf), so allow ~1 bf16
    # ulp of the normalized activation on the max error.
    assert max_err < 2e-2, (max_err, mean_err)
    assert mean_err < 2e-3, (max_err, mean_err)

    print("KERNEL_OK")
</pallas_src>

<mosaic_0001>
module attributes {stable_mosaic.version = 11 : i64} {
  func.func @bn_kernel(%arg0: i32, %arg1: i32, %arg2: memref<1x20x64xbf16, #tpu.memory_space<vmem>>, %arg3: memref<20x1xf32, #tpu.memory_space<vmem>>, %arg4: memref<20x1xf32, #tpu.memory_space<vmem>>, %arg5: memref<1x20x64xf32, #tpu.memory_space<vmem>>) attributes {dimension_semantics = [#tpu.dimension_semantics<parallel>, #tpu.dimension_semantics<parallel>], iteration_bounds = array<i64: 2, 1>, scalar_prefetch = 0 : i64, scratch_operands = 0 : i64, tpu.core_type = #tpu.core_type<tc>, window_params = [{transform_indices = @transform_0, window_bounds = array<i64: 1, 20, 64>}, {pipeline_mode = #tpu.pipeline_mode<synchronous>, transform_indices = @transform_1, window_bounds = array<i64: 20, 1>}, {pipeline_mode = #tpu.pipeline_mode<synchronous>, transform_indices = @transform_2, window_bounds = array<i64: 20, 1>}, {transform_indices = @transform_3, window_bounds = array<i64: 1, 20, 64>}]} {
    %c0 = arith.constant 0 : index
    %c0_0 = arith.constant 0 : index
    %c0_1 = arith.constant 0 : index
    %0 = vector.load %arg2[%c0, %c0_0, %c0_1] : memref<1x20x64xbf16, #tpu.memory_space<vmem>>, vector<1x20x64xbf16>
    %1 = arith.extf %0 : vector<1x20x64xbf16> to vector<1x20x64xf32>
    %c0_2 = arith.constant 0 : index
    %c0_3 = arith.constant 0 : index
    %2 = vector.load %arg3[%c0_2, %c0_3] : memref<20x1xf32, #tpu.memory_space<vmem>>, vector<20x1xf32>
    %3 = vector.shape_cast %2 : vector<20x1xf32> to vector<1x20x1xf32>
    %4 = vector.broadcast %3 : vector<1x20x1xf32> to vector<1x20x64xf32>
    %5 = arith.mulf %1, %4 : vector<1x20x64xf32>
    %c0_4 = arith.constant 0 : index
    %c0_5 = arith.constant 0 : index
    %6 = vector.load %arg4[%c0_4, %c0_5] : memref<20x1xf32, #tpu.memory_space<vmem>>, vector<20x1xf32>
    %7 = vector.shape_cast %6 : vector<20x1xf32> to vector<1x20x1xf32>
    %8 = vector.broadcast %7 : vector<1x20x1xf32> to vector<1x20x64xf32>
    %9 = arith.addf %5, %8 : vector<1x20x64xf32>
    %c0_6 = arith.constant 0 : index
    %c0_7 = arith.constant 0 : index
    %c0_8 = arith.constant 0 : index
    %10 = vector.load %arg5[%c0_6, %c0_7, %c0_8] : memref<1x20x64xf32, #tpu.memory_space<vmem>>, vector<1x20x64xf32>
    tpu.vector_store %arg5[%c0_6, %c0_7, %c0_8], %9 {strides = array<i32>} : memref<1x20x64xf32, #tpu.memory_space<vmem>>, vector<1x20x64xf32>,
    return
  }
  func.func @transform_0(%arg0: i32, %arg1: i32) -> (i32, i32, i32) {
    %c0_i32 = arith.constant 0 : i32
    %c0_i32_0 = arith.constant 0 : i32
    return %arg0, %c0_i32, %arg1 : i32, i32, i32
  }
  func.func @transform_1(%arg0: i32, %arg1: i32) -> (i32, i32) {
    %c0_i32 = arith.constant 0 : i32
    %c0_i32_0 = arith.constant 0 : i32
    %c0_i32_1 = arith.constant 0 : i32
    return %c0_i32, %c0_i32_0 : i32, i32
  }
  func.func @transform_2(%arg0: i32, %arg1: i32) -> (i32, i32) {
    %c0_i32 = arith.constant 0 : i32
    %c0_i32_0 = arith.constant 0 : i32
    %c0_i32_1 = arith.constant 0 : i32
    return %c0_i32, %c0_i32_0 : i32, i32
  }
  func.func @transform_3(%arg0: i32, %arg1: i32) -> (i32, i32, i32) {
    %c0_i32 = arith.constant 0 : i32
    %c0_i32_0 = arith.constant 0 : i32
    return %arg0, %c0_i32, %arg1 : i32, i32, i32
  }
}

module attributes {stable_mosaic.version = 11 : i64} {
  func.func @conv_kernel(%arg0: i32, %arg1: memref<1x40x64xbf16, #tpu.memory_space<vmem>>, %arg2: memref<1x64xi32, #tpu.memory_space<vmem>>, %arg3: memref<16x40xbf16, #tpu.memory_space<vmem>>, %arg4: memref<20x720xbf16, #tpu.memory_space<vmem>>, %arg5: memref<1x20x64xbf16, #tpu.memory_space<vmem>>, %arg6: memref<1x20x2xf32, #tpu.memory_space<vmem>>, %arg7: memref<16x352xbf16, #tpu.memory_space<vmem>>, %arg8: memref<720x64xbf16, #tpu.memory_space<vmem>>) attributes {dimension_semantics = [#tpu.dimension_semantics<parallel>], iteration_bounds = array<i64: 2>, scalar_prefetch = 0 : i64, scratch_operands = 2 : i64, tpu.core_type = #tpu.core_type<tc>, window_params = [{transform_indices = @transform_0, window_bounds = array<i64: 1, 40, 64>}, {pipeline_mode = #tpu.pipeline_mode<synchronous>, transform_indices = @transform_1, window_bounds = array<i64: 1, 64>}, {pipeline_mode = #tpu.pipeline_mode<synchronous>, transform_indices = @transform_2, window_bounds = array<i64: 16, 40>}, {pipeline_mode = #tpu.pipeline_mode<synchronous>, transform_indices = @transform_3, window_bounds = array<i64: 20, 720>}, {transform_indices = @transform_4, window_bounds = array<i64: 1, 20, 64>}, {transform_indices = @transform_5, window_bounds = array<i64: 1, 20, 2>}]} {
    %c0 = arith.constant 0 : index
    %c0_0 = arith.constant 0 : index
    %0 = vector.load %arg3[%c0, %c0_0] : memref<16x40xbf16, #tpu.memory_space<vmem>>, vector<16x40xbf16>
    %c0_1 = arith.constant 0 : index
    %c0_2 = arith.constant 0 : index
    %c0_3 = arith.constant 0 : index
    %1 = vector.load %arg1[%c0_1, %c0_2, %c0_3] : memref<1x40x64xbf16, #tpu.memory_space<vmem>>, vector<1x40x64xbf16>
    %2 = vector.shape_cast %1 : vector<1x40x64xbf16> to vector<40x64xbf16>
    %cst = arith.constant dense<0.000000e+00> : vector<16x64xf32>
    %3 = tpu.matmul %0, %2, %cst {dimension_numbers = #tpu.dot_dimension_numbers<[1], [0], [0], [1], [0, 0, 1, 1], [], []>} : vector<16x40xbf16>, vector<40x64xbf16>, vector<16x64xf32> -> vector<16x64xf32>
    %cst_4 = arith.constant 0.000000e+00 : bf16
    %4 = vector.broadcast %cst_4 : bf16 to vector<16x144xbf16>
    %c0_5 = arith.constant 0 : index
    %c0_6 = arith.constant 0 : index
    %5 = vector.load %arg7[%c0_5, %c0_6] : memref<16x352xbf16, #tpu.memory_space<vmem>>, vector<16x144xbf16>
    tpu.vector_store %arg7[%c0_5, %c0_6], %4 {strides = array<i32>} : memref<16x352xbf16, #tpu.memory_space<vmem>>, vector<16x144xbf16>,
    %cst_7 = arith.constant 0.000000e+00 : bf16
    %6 = vector.broadcast %cst_7 : bf16 to vector<16x144xbf16>
    %c0_8 = arith.constant 0 : index
    %c208 = arith.constant 208 : index
    %7 = vector.load %arg7[%c0_8, %c208] : memref<16x352xbf16, #tpu.memory_space<vmem>>, vector<16x144xbf16>
    tpu.vector_store %arg7[%c0_8, %c208], %6 {strides = array<i32>} : memref<16x352xbf16, #tpu.memory_space<vmem>>, vector<16x144xbf16>,
    %8 = arith.truncf %3 : vector<16x64xf32> to vector<16x64xbf16>
    %c0_9 = arith.constant 0 : index
    %c144 = arith.constant 144 : index
    %9 = vector.load %arg7[%c0_9, %c144] : memref<16x352xbf16, #tpu.memory_space<vmem>>, vector<16x64xbf16>
    tpu.vector_store %arg7[%c0_9, %c144], %8 {strides = array<i32>} : memref<16x352xbf16, #tpu.memory_space<vmem>>, vector<16x64xbf16>,
    %10 = tpu.iota {dimensions = array<i32: 1>} : vector<1x64xi32>
    %c0_10 = arith.constant 0 : index
    %c0_11 = arith.constant 0 : index
    %11 = vector.load %arg2[%c0_10, %c0_11] : memref<1x64xi32, #tpu.memory_space<vmem>>, vector<1x64xi32>
    %c8_i32 = arith.constant 8 : i32
    %12 = vector.broadcast %c8_i32 : i32 to vector<1x64xi32>
    %13 = arith.cmpi sge, %10, %12 : vector<1x64xi32>
    %c72_i32 = arith.constant 72 : i32
    %14 = vector.broadcast %c72_i32 : i32 to vector<1x64xi32>
    %15 = arith.cmpi slt, %10, %14 : vector<1x64xi32>
    %16 = arith.andi %13, %15 : vector<1x64xi1>
    %c1_i32 = arith.constant 1 : i32
    %17 = vector.broadcast %c1_i32 : i32 to vector<1x64xi32>
    %18 = arith.cmpi sge, %11, %17 : vector<1x64xi32>
    %c9_i32 = arith.constant 9 : i32
    %19 = vector.broadcast %c9_i32 : i32 to vector<1x64xi32>
    %20 = arith.cmpi slt, %11, %19 : vector<1x64xi32>
    %21 = arith.andi %18, %20 : vector<1x64xi1>
    %c-8_i32 = arith.constant -8 : i32
    %22 = vector.broadcast %c-8_i32 : i32 to vector<1x64xi32>
    %23 = arith.cmpi sge, %10, %22 : vector<1x64xi32>
    %c56_i32 = arith.constant 56 : i32
    %24 = vector.broadcast %c56_i32 : i32 to vector<1x64xi32>
    %25 = arith.cmpi slt, %10, %24 : vector<1x64xi32>
    %26 = arith.andi %23, %25 : vector<1x64xi1>
    %c-1_i32 = arith.constant -1 : i32
    %27 = vector.broadcast %c-1_i32 : i32 to vector<1x64xi32>
    %28 = arith.cmpi sge, %11, %27 : vector<1x64xi32>
    %c7_i32 = arith.constant 7 : i32
    %29 = vector.broadcast %c7_i32 : i32 to vector<1x64xi32>
    %30 = arith.cmpi slt, %11, %29 : vector<1x64xi32>
    %31 = arith.andi %28, %30 : vector<1x64xi1>
    %c16_i32 = arith.constant 16 : i32
    %32 = vector.broadcast %c16_i32 : i32 to vector<1x64xi32>
    %33 = arith.cmpi sge, %10, %32 : vector<1x64xi32>
    %c80_i32 = arith.constant 80 : i32
    %34 = vector.broadcast %c80_i32 : i32 to vector<1x64xi32>
    %35 = arith.cmpi slt, %10, %34 : vector<1x64xi32>
    %36 = arith.andi %33, %35 : vector<1x64xi1>
    %c2_i32 = arith.constant 2 : i32
    %37 = vector.broadcast %c2_i32 : i32 to vector<1x64xi32>
    %38 = arith.cmpi sge, %11, %37 : vector<1x64xi32>
    %c10_i32 = arith.constant 10 : i32
    %39 = vector.broadcast %c10_i32 : i32 to vector<1x64xi32>
    %40 = arith.cmpi slt, %11, %39 : vector<1x64xi32>
    %41 = arith.andi %38, %40 : vector<1x64xi1>
    %c-16_i32 = arith.constant -16 : i32
    %42 = vector.broadcast %c-16_i32 : i32 to vector<1x64xi32>
    %43 = arith.cmpi sge, %10, %42 : vector<1x64xi32>
    %c48_i32 = arith.constant 48 : i32
    %44 = vector.broadcast %c48_i32 : i32 to vector<1x64xi32>
    %45 = arith.cmpi slt, %10, %44 : vector<1x64xi32>
    %46 = arith.andi %43, %45 : vector<1x64xi1>
    %c-2_i32 = arith.constant -2 : i32
    %47 = vector.broadcast %c-2_i32 : i32 to vector<1x64xi32>
    %48 = arith.cmpi sge, %11, %47 : vector<1x64xi32>
    %c6_i32 = arith.constant 6 : i32
    %49 = vector.broadcast %c6_i32 : i32 to vector<1x64xi32>
    %50 = arith.cmpi slt, %11, %49 : vector<1x64xi32>
    %51 = arith.andi %48, %50 : vector<1x64xi1>
    %c32_i32 = arith.constant 32 : i32
    %52 = vector.broadcast %c32_i32 : i32 to vector<1x64xi32>
    %53 = arith.cmpi sge, %10, %52 : vector<1x64xi32>
    %c96_i32 = arith.constant 96 : i32
    %54 = vector.broadcast %c96_i32 : i32 to vector<1x64xi32>
    %55 = arith.cmpi slt, %10, %54 : vector<1x64xi32>
    %56 = arith.andi %53, %55 : vector<1x64xi1>
    %c4_i32 = arith.constant 4 : i32
    %57 = vector.broadcast %c4_i32 : i32 to vector<1x64xi32>
    %58 = arith.cmpi sge, %11, %57 : vector<1x64xi32>
    %c12_i32 = arith.constant 12 : i32
    %59 = vector.broadcast %c12_i32 : i32 to vector<1x64xi32>
    %60 = arith.cmpi slt, %11, %59 : vector<1x64xi32>
    %61 = arith.andi %58, %60 : vector<1x64xi1>
    %c-32_i32 = arith.constant -32 : i32
    %62 = vector.broadcast %c-32_i32 : i32 to vector<1x64xi32>
    %63 = arith.cmpi sge, %10, %62 : vector<1x64xi32>
    %c32_i32_12 = arith.constant 32 : i32
    %64 = vector.broadcast %c32_i32_12 : i32 to vector<1x64xi32>
    %65 = arith.cmpi slt, %10, %64 : vector<1x64xi32>
    %66 = arith.andi %63, %65 : vector<1x64xi1>
    %c-4_i32 = arith.constant -4 : i32
    %67 = vector.broadcast %c-4_i32 : i32 to vector<1x64xi32>
    %68 = arith.cmpi sge, %11, %67 : vector<1x64xi32>
    %c4_i32_13 = arith.constant 4 : i32
    %69 = vector.broadcast %c4_i32_13 : i32 to vector<1x64xi32>
    %70 = arith.cmpi slt, %11, %69 : vector<1x64xi32>
    %71 = arith.andi %68, %70 : vector<1x64xi1>
    %c64_i32 = arith.constant 64 : i32
    %72 = vector.broadcast %c64_i32 : i32 to vector<1x64xi32>
    %73 = arith.cmpi sge, %10, %72 : vector<1x64xi32>
    %c128_i32 = arith.constant 128 : i32
    %74 = vector.broadcast %c128_i32 : i32 to vector<1x64xi32>
    %75 = arith.cmpi slt, %10, %74 : vector<1x64xi32>
    %76 = arith.andi %73, %75 : vector<1x64xi1>
    %c8_i32_14 = arith.constant 8 : i32
    %77 = vector.broadcast %c8_i32_14 : i32 to vector<1x64xi32>
    %78 = arith.cmpi sge, %11, %77 : vector<1x64xi32>
    %c16_i32_15 = arith.constant 16 : i32
    %79 = vector.broadcast %c16_i32_15 : i32 to vector<1x64xi32>
    %80 = arith.cmpi slt, %11, %79 : vector<1x64xi32>
    %81 = arith.andi %78, %80 : vector<1x64xi1>
    %c-64_i32 = arith.constant -64 : i32
    %82 = vector.broadcast %c-64_i32 : i32 to vector<1x64xi32>
    %83 = arith.cmpi sge, %10, %82 : vector<1x64xi32>
    %c0_i32 = arith.constant 0 : i32
    %84 = vector.broadcast %c0_i32 : i32 to vector<1x64xi32>
    %85 = arith.cmpi slt, %10, %84 : vector<1x64xi32>
    %86 = arith.andi %83, %85 : vector<1x64xi1>
    %c-8_i32_16 = arith.constant -8 : i32
    %87 = vector.broadcast %c-8_i32_16 : i32 to vector<1x64xi32>
    %88 = arith.cmpi sge, %11, %87 : vector<1x64xi32>
    %c0_i32_17 = arith.constant 0 : i32
    %89 = vector.broadcast %c0_i32_17 : i32 to vector<1x64xi32>
    %90 = arith.cmpi slt, %11, %89 : vector<1x64xi32>
    %91 = arith.andi %88, %90 : vector<1x64xi1>
    %c128_i32_18 = arith.constant 128 : i32
    %92 = vector.broadcast %c128_i32_18 : i32 to vector<1x64xi32>
    %93 = arith.cmpi sge, %10, %92 : vector<1x64xi32>
    %c192_i32 = arith.constant 192 : i32
    %94 = vector.broadcast %c192_i32 : i32 to vector<1x64xi32>
    %95 = arith.cmpi slt, %10, %94 : vector<1x64xi32>
    %96 = arith.andi %93, %95 : vector<1x64xi1>
    %c16_i32_19 = arith.constant 16 : i32
    %97 = vector.broadcast %c16_i32_19 : i32 to vector<1x64xi32>
    %98 = arith.cmpi sge, %11, %97 : vector<1x64xi32>
    %c24_i32 = arith.constant 24 : i32
    %99 = vector.broadcast %c24_i32 : i32 to vector<1x64xi32>
    %100 = arith.cmpi slt, %11, %99 : vector<1x64xi32>
    %101 = arith.andi %98, %100 : vector<1x64xi1>
    %c-128_i32 = arith.constant -128 : i32
    %102 = vector.broadcast %c-128_i32 : i32 to vector<1x64xi32>
    %103 = arith.cmpi sge, %10, %102 : vector<1x64xi32>
    %c-64_i32_20 = arith.constant -64 : i32
    %104 = vector.broadcast %c-64_i32_20 : i32 to vector<1x64xi32>
    %105 = arith.cmpi slt, %10, %104 : vector<1x64xi32>
    %106 = arith.andi %103, %105 : vector<1x64xi1>
    %c-16_i32_21 = arith.constant -16 : i32
    %107 = vector.broadcast %c-16_i32_21 : i32 to vector<1x64xi32>
    %108 = arith.cmpi sge, %11, %107 : vector<1x64xi32>
    %c-8_i32_22 = arith.constant -8 : i32
    %109 = vector.broadcast %c-8_i32_22 : i32 to vector<1x64xi32>
    %110 = arith.cmpi slt, %11, %109 : vector<1x64xi32>
    %111 = arith.andi %108, %110 : vector<1x64xi1>
    %c0_23 = arith.constant 0 : index
    %c135 = arith.constant 135 : index
    %112 = vector.load %arg7[%c0_23, %c135] : memref<16x352xbf16, #tpu.memory_space<vmem>>, vector<16x64xbf16>
    %113 = arith.andi %16, %21 : vector<1x64xi1>
    %cst_24 = arith.constant 0.000000e+00 : bf16
    %114 = vector.broadcast %cst_24 : bf16 to vector<16x64xbf16>
    %115 = vector.shape_cast %113 : vector<1x64xi1> to vector<1x64xi1>
    %116 = vector.broadcast %115 : vector<1x64xi1> to vector<16x64xi1>
    %117 = arith.select %116, %112, %114 : vector<16x64xi1>, vector<16x64xbf16>
    %c0_25 = arith.constant 0 : index
    %c0_26 = arith.constant 0 : index
    %118 = vector.load %arg8[%c0_25, %c0_26] : memref<720x64xbf16, #tpu.memory_space<vmem>>, vector<16x64xbf16>
    tpu.vector_store %arg8[%c0_25, %c0_26], %117 {strides = array<i32>} : memref<720x64xbf16, #tpu.memory_space<vmem>>, vector<16x64xbf16>,
    %c0_27 = arith.constant 0 : index
    %c136 = arith.constant 136 : index
    %119 = vector.load %arg7[%c0_27, %c136] : memref<16x352xbf16, #tpu.memory_space<vmem>>, vector<16x64xbf16>
    %cst_28 = arith.constant 0.000000e+00 : bf16
    %120 = vector.broadcast %cst_28 : bf16 to vector<16x64xbf16>
    %121 = vector.shape_cast %16 : vector<1x64xi1> to vector<1x64xi1>
    %122 = vector.broadcast %121 : vector<1x64xi1> to vector<16x64xi1>
    %123 = arith.select %122, %119, %120 : vector<16x64xi1>, vector<16x64xbf16>
    %c16 = arith.constant 16 : index
    %c0_29 = arith.constant 0 : index
    %124 = vector.load %arg8[%c16, %c0_29] : memref<720x64xbf16, #tpu.memory_space<vmem>>, vector<16x64xbf16>
    tpu.vector_store %arg8[%c16, %c0_29], %123 {strides = array<i32>} : memref<720x64xbf16, #tpu.memory_space<vmem>>, vector<16x64xbf16>,
    %c0_30 = arith.constant 0 : index
    %c137 = arith.constant 137 : index
    %125 = vector.load %arg7[%c0_30, %c137] : memref<16x352xbf16, #tpu.memory_space<vmem>>, vector<16x64xbf16>
    %126 = arith.andi %16, %31 : vector<1x64xi1>
    %cst_31 = arith.constant 0.000000e+00 : bf16
    %127 = vector.broadcast %cst_31 : bf16 to vector<16x64xbf16>
    %128 = vector.shape_cast %126 : vector<1x64xi1> to vector<1x64xi1>
    %129 = vector.broadcast %128 : vector<1x64xi1> to vector<16x64xi1>
    %130 = arith.select %129, %125, %127 : vector<16x64xi1>, vector<16x64xbf16>
    %c32 = arith.constant 32 : index
    %c0_32 = arith.constant 0 : index
    %131 = vector.load %arg8[%c32, %c0_32] : memref<720x64xbf16, #tpu.memory_space<vmem>>, vector<16x64xbf16>
    tpu.vector_store %arg8[%c32, %c0_32], %130 {strides = array<i32>} : memref<720x64xbf16, #tpu.memory_space<vmem>>, vector<16x64xbf16>,
    %c0_33 = arith.constant 0 : index
    %c143 = arith.constant 143 : index
    %132 = vector.load %arg7[%c0_33, %c143] : memref<16x352xbf16, #tpu.memory_space<vmem>>, vector<16x64xbf16>
    %cst_34 = arith.constant 0.000000e+00 : bf16
    %133 = vector.broadcast %cst_34 : bf16 to vector<16x64xbf16>
    %134 = vector.shape_cast %21 : vector<1x64xi1> to vector<1x64xi1>
    %135 = vector.broadcast %134 : vector<1x64xi1> to vector<16x64xi1>
    %136 = arith.select %135, %132, %133 : vector<16x64xi1>, vector<16x64xbf16>
    %c48 = arith.constant 48 : index
    %c0_35 = arith.constant 0 : index
    %137 = vector.load %arg8[%c48, %c0_35] : memref<720x64xbf16, #tpu.memory_space<vmem>>, vector<16x64xbf16>
    tpu.vector_store %arg8[%c48, %c0_35], %136 {strides = array<i32>} : memref<720x64xbf16, #tpu.memory_space<vmem>>, vector<16x64xbf16>,
    %c0_36 = arith.constant 0 : index
    %c144_37 = arith.constant 144 : index
    %138 = vector.load %arg7[%c0_36, %c144_37] : memref<16x352xbf16, #tpu.memory_space<vmem>>, vector<16x64xbf16>
    %c64 = arith.constant 64 : index
    %c0_38 = arith.constant 0 : index
    %139 = vector.load %arg8[%c64, %c0_38] : memref<720x64xbf16, #tpu.memory_space<vmem>>, vector<16x64xbf16>
    tpu.vector_store %arg8[%c64, %c0_38], %138 {strides = array<i32>} : memref<720x64xbf16, #tpu.memory_space<vmem>>, vector<16x64xbf16>,
    %c0_39 = arith.constant 0 : index
    %c145 = arith.constant 145 : index
    %140 = vector.load %arg7[%c0_39, %c145] : memref<16x352xbf16, #tpu.memory_space<vmem>>, vector<16x64xbf16>
    %cst_40 = arith.constant 0.000000e+00 : bf16
    %141 = vector.broadcast %cst_40 : bf16 to vector<16x64xbf16>
    %142 = vector.shape_cast %31 : vector<1x64xi1> to vector<1x64xi1>
    %143 = vector.broadcast %142 : vector<1x64xi1> to vector<16x64xi1>
    %144 = arith.select %143, %140, %141 : vector<16x64xi1>, vector<16x64xbf16>
    %c80 = arith.constant 80 : index
    %c0_41 = arith.constant 0 : index
    %145 = vector.load %arg8[%c80, %c0_41] : memref<720x64xbf16, #tpu.memory_space<vmem>>, vector<16x64xbf16>
    tpu.vector_store %arg8[%c80, %c0_41], %144 {strides = array<i32>} : memref<720x64xbf16, #tpu.memory_space<vmem>>, vector<16x64xbf16>,
    %c0_42 = arith.constant 0 : index
    %c151 = arith.constant 151 : index
    %146 = vector.load %arg7[%c0_42, %c151] : memref<16x352xbf16, #tpu.memory_space<vmem>>, vector<16x64xbf16>
    %147 = arith.andi %26, %21 : vector<1x64xi1>
    %cst_43 = arith.constant 0.000000e+00 : bf16
    %148 = vector.broadcast %cst_43 : bf16 to vector<16x64xbf16>
    %149 = vector.shape_cast %147 : vector<1x64xi1> to vector<1x64xi1>
    %150 = vector.broadcast %149 : vector<1x64xi1> to vector<16x64xi1>
    %151 = arith.select %150, %146, %148 : vector<16x64xi1>, vector<16x64xbf16>
    %c96 = arith.constant 96 : index
    %c0_44 = arith.constant 0 : index
    %152 = vector.load %arg8[%c96, %c0_44] : memref<720x64xbf16, #tpu.memory_space<vmem>>, vector<16x64xbf16>
    tpu.vector_store %arg8[%c96, %c0_44], %151 {strides = array<i32>} : memref<720x64xbf16, #tpu.memory_space<vmem>>, vector<16x64xbf16>,
    %c0_45 = arith.constant 0 : index
    %c152 = arith.constant 152 : index
    %153 = vector.load %arg7[%c0_45, %c152] : memref<16x352xbf16, #tpu.memory_space<vmem>>, vector<16x64xbf16>
    %cst_46 = arith.constant 0.000000e+00 : bf16
    %154 = vector.broadcast %cst_46 : bf16 to vector<16x64xbf16>
    %155 = vector.shape_cast %26 : vector<1x64xi1> to vector<1x64xi1>
    %156 = vector.broadcast %155 : vector<1x64xi1> to vector<16x64xi1>
    %157 = arith.select %156, %153, %154 : vector<16x64xi1>, vector<16x64xbf16>
    %c112 = arith.constant 112 : index
    %c0_47 = arith.constant 0 : index
    %158 = vector.load %arg8[%c112, %c0_47] : memref<720x64xbf16, #tpu.memory_space<vmem>>, vector<16x64xbf16>
    tpu.vector_store %arg8[%c112, %c0_47], %157 {strides = array<i32>} : memref<720x64xbf16, #tpu.memory_space<vmem>>, vector<16x64xbf16>,
    %c0_48 = arith.constant 0 : index
    %c153 = arith.constant 153 : index
    %159 = vector.load %arg7[%c0_48, %c153] : memref<16x352xbf16, #tpu.memory_space<vmem>>, vector<16x64xbf16>
    %160 = arith.andi %26, %31 : vector<1x64xi1>
    %cst_49 = arith.constant 0.000000e+00 : bf16
    %161 = vector.broadcast %cst_49 : bf16 to vector<16x64xbf16>
    %162 = vector.shape_cast %160 : vector<1x64xi1> to vector<1x64xi1>
    %163 = vector.broadcast %162 : vector<1x64xi1> to vector<16x64xi1>
    %164 = arith.select %163, %159, %161 : vector<16x64xi1>, vector<16x64xbf16>
    %c128 = arith.constant 128 : index
    %c0_50 = arith.constant 0 : index
    %165 = vector.load %arg8[%c128, %c0_50] : memref<720x64xbf16, #tpu.memory_space<vmem>>, vector<16x64xbf16>
    tpu.vector_store %arg8[%c128, %c0_50], %164 {strides = array<i32>} : memref<720x64xbf16, #tpu.memory_space<vmem>>, vector<16x64xbf16>,
    %c0_51 = arith.constant 0 : index
    %c126 = arith.constant 126 : index
    %166 = vector.load %arg7[%c0_51, %c126] : memref<16x352xbf16, #tpu.memory_space<vmem>>, vector<16x64xbf16>
    %167 = arith.andi %36, %41 : vector<1x64xi1>
    %cst_52 = arith.constant 0.000000e+00 : bf16
    %168 = vector.broadcast %cst_52 : bf16 to vector<16x64xbf16>
    %169 = vector.shape_cast %167 : vector<1x64xi1> to vector<1x64xi1>
    %170 = vector.broadcast %169 : vector<1x64xi1> to vector<16x64xi1>
    %171 = arith.select %170, %166, %168 : vector<16x64xi1>, vector<16x64xbf16>
    %c144_53 = arith.constant 144 : index
    %c0_54 = arith.constant 0 : index
    %172 = vector.load %arg8[%c144_53, %c0_54] : memref<720x64xbf16, #tpu.memory_space<vmem>>, vector<16x64xbf16>
    tpu.vector_store %arg8[%c144_53, %c0_54], %171 {strides = array<i32>} : memref<720x64xbf16, #tpu.memory_space<vmem>>, vector<16x64xbf16>,
    %c0_55 = arith.constant 0 : index
    %c128_56 = arith.constant 128 : index
    %173 = vector.load %arg7[%c0_55, %c128_56] : memref<16x352xbf16, #tpu.memory_space<vmem>>, vector<16x64xbf16>
    %cst_57 = arith.constant 0.000000e+00 : bf16
    %174 = vector.broadcast %cst_57 : bf16 to vector<16x64xbf16>
    %175 = vector.shape_cast %36 : vector<1x64xi1> to vector<1x64xi1>
    %176 = vector.broadcast %175 : vector<1x64xi1> to vector<16x64xi1>
    %177 = arith.select %176, %173, %174 : vector<16x64xi1>, vector<16x64xbf16>
    %c160 = arith.constant 160 : index
    %c0_58 = arith.constant 0 : index
    %178 = vector.load %arg8[%c160, %c0_58] : memref<720x64xbf16, #tpu.memory_space<vmem>>, vector<16x64xbf16>
    tpu.vector_store %arg8[%c160, %c0_58], %177 {strides = array<i32>} : memref<720x64xbf16, #tpu.memory_space<vmem>>, vector<16x64xbf16>,
    %c0_59 = arith.constant 0 : index
    %c130 = arith.constant 130 : index
    %179 = vector.load %arg7[%c0_59, %c130] : memref<16x352xbf16, #tpu.memory_space<vmem>>, vector<16x64xbf16>
    %180 = arith.andi %36, %51 : vector<1x64xi1>
    %cst_60 = arith.constant 0.000000e+00 : bf16
    %181 = vector.broadcast %cst_60 : bf16 to vector<16x64xbf16>
    %182 = vector.shape_cast %180 : vector<1x64xi1> to vector<1x64xi1>
    %183 = vector.broadcast %182 : vector<1x64xi1> to vector<16x64xi1>
    %184 = arith.select %183, %179, %181 : vector<16x64xi1>, vector<16x64xbf16>
    %c176 = arith.constant 176 : index
    %c0_61 = arith.constant 0 : index
    %185 = vector.load %arg8[%c176, %c0_61] : memref<720x64xbf16, #tpu.memory_space<vmem>>, vector<16x64xbf16>
    tpu.vector_store %arg8[%c176, %c0_61], %184 {strides = array<i32>} : memref<720x64xbf16, #tpu.memory_space<vmem>>, vector<16x64xbf16>,
    %c0_62 = arith.constant 0 : index
    %c142 = arith.constant 142 : index
    %186 = vector.load %arg7[%c0_62, %c142] : memref<16x352xbf16, #tpu.memory_space<vmem>>, vector<16x64xbf16>
    %cst_63 = arith.constant 0.000000e+00 : bf16
    %187 = vector.broadcast %cst_63 : bf16 to vector<16x64xbf16>
    %188 = vector.shape_cast %41 : vector<1x64xi1> to vector<1x64xi1>
    %189 = vector.broadcast %188 : vector<1x64xi1> to vector<16x64xi1>
    %190 = arith.select %189, %186, %187 : vector<16x64xi1>, vector<16x64xbf16>
    %c192 = arith.constant 192 : index
    %c0_64 = arith.constant 0 : index
    %191 = vector.load %arg8[%c192, %c0_64] : memref<720x64xbf16, #tpu.memory_space<vmem>>, vector<16x64xbf16>
    tpu.vector_store %arg8[%c192, %c0_64], %190 {strides = array<i32>} : memref<720x64xbf16, #tpu.memory_space<vmem>>, vector<16x64xbf16>,
    %c0_65 = arith.constant 0 : index
    %c144_66 = arith.constant 144 : index
    %192 = vector.load %arg7[%c0_65, %c144_66] : memref<16x352xbf16, #tpu.memory_space<vmem>>, vector<16x64xbf16>
    %c208_67 = arith.constant 208 : index
    %c0_68 = arith.constant 0 : index
    %193 = vector.load %arg8[%c208_67, %c0_68] : memref<720x64xbf16, #tpu.memory_space<vmem>>, vector<16x64xbf16>
    tpu.vector_store %arg8[%c208_67, %c0_68], %192 {strides = array<i32>} : memref<720x64xbf16, #tpu.memory_space<vmem>>, vector<16x64xbf16>,
    %c0_69 = arith.constant 0 : index
    %c146 = arith.constant 146 : index
    %194 = vector.load %arg7[%c0_69, %c146] : memref<16x352xbf16, #tpu.memory_space<vmem>>, vector<16x64xbf16>
    %cst_70 = arith.constant 0.000000e+00 : bf16
    %195 = vector.broadcast %cst_70 : bf16 to vector<16x64xbf16>
    %196 = vector.shape_cast %51 : vector<1x64xi1> to vector<1x64xi1>
    %197 = vector.broadcast %196 : vector<1x64xi1> to vector<16x64xi1>
    %198 = arith.select %197, %194, %195 : vector<16x64xi1>, vector<16x64xbf16>
    %c224 = arith.constant 224 : index
    %c0_71 = arith.constant 0 : index
    %199 = vector.load %arg8[%c224, %c0_71] : memref<720x64xbf16, #tpu.memory_space<vmem>>, vector<16x64xbf16>
    tpu.vector_store %arg8[%c224, %c0_71], %198 {strides = array<i32>} : memref<720x64xbf16, #tpu.memory_space<vmem>>, vector<16x64xbf16>,
    %c0_72 = arith.constant 0 : index
    %c158 = arith.constant 158 : index
    %200 = vector.load %arg7[%c0_72, %c158] : memref<16x352xbf16, #tpu.memory_space<vmem>>, vector<16x64xbf16>
    %201 = arith.andi %46, %41 : vector<1x64xi1>
    %cst_73 = arith.constant 0.000000e+00 : bf16
    %202 = vector.broadcast %cst_73 : bf16 to vector<16x64xbf16>
    %203 = vector.shape_cast %201 : vector<1x64xi1> to vector<1x64xi1>
    %204 = vector.broadcast %203 : vector<1x64xi1> to vector<16x64xi1>
    %205 = arith.select %204, %200, %202 : vector<16x64xi1>, vector<16x64xbf16>
    %c240 = arith.constant 240 : index
    %c0_74 = arith.constant 0 : index
    %206 = vector.load %arg8[%c240, %c0_74] : memref<720x64xbf16, #tpu.memory_space<vmem>>, vector<16x64xbf16>
    tpu.vector_store %arg8[%c240, %c0_74], %205 {strides = array<i32>} : memref<720x64xbf16, #tpu.memory_space<vmem>>, vector<16x64xbf16>,
    %c0_75 = arith.constant 0 : index
    %c160_76 = arith.constant 160 : index
    %207 = vector.load %arg7[%c0_75, %c160_76] : memref<16x352xbf16, #tpu.memory_space<vmem>>, vector<16x64xbf16>
    %cst_77 = arith.constant 0.000000e+00 : bf16
    %208 = vector.broadcast %cst_77 : bf16 to vector<16x64xbf16>
    %209 = vector.shape_cast %46 : vector<1x64xi1> to vector<1x64xi1>
    %210 = vector.broadcast %209 : vector<1x64xi1> to vector<16x64xi1>
    %211 = arith.select %210, %207, %208 : vector<16x64xi1>, vector<16x64xbf16>
    %c256 = arith.constant 256 : index
    %c0_78 = arith.constant 0 : index
    %212 = vector.load %arg8[%c256, %c0_78] : memref<720x64xbf16, #tpu.memory_space<vmem>>, vector<16x64xbf16>
    tpu.vector_store %arg8[%c256, %c0_78], %211 {strides = array<i32>} : memref<720x64xbf16, #tpu.memory_space<vmem>>, vector<16x64xbf16>,
    %c0_79 = arith.constant 0 : index
    %c162 = arith.constant 162 : index
    %213 = vector.load %arg7[%c0_79, %c162] : memref<16x352xbf16, #tpu.memory_space<vmem>>, vector<16x64xbf16>
    %214 = arith.andi %46, %51 : vector<1x64xi1>
    %cst_80 = arith.constant 0.000000e+00 : bf16
    %215 = vector.broadcast %cst_80 : bf16 to vector<16x64xbf16>
    %216 = vector.shape_cast %214 : vector<1x64xi1> to vector<1x64xi1>
    %217 = vector.broadcast %216 : vector<1x64xi1> to vector<16x64xi1>
    %218 = arith.select %217, %213, %215 : vector<16x64xi1>, vector<16x64xbf16>
    %c272 = arith.constant 272 : index
    %c0_81 = arith.constant 0 : index
    %219 = vector.load %arg8[%c272, %c0_81] : memref<720x64xbf16, #tpu.memory_space<vmem>>, vector<16x64xbf16>
    tpu.vector_store %arg8[%c272, %c0_81], %218 {strides = array<i32>} : memref<720x64xbf16, #tpu.memory_space<vmem>>, vector<16x64xbf16>,
    %c0_82 = arith.constant 0 : index
    %c108 = arith.constant 108 : index
    %220 = vector.load %arg7[%c0_82, %c108] : memref<16x352xbf16, #tpu.memory_space<vmem>>, vector<16x64xbf16>
    %221 = arith.andi %56, %61 : vector<1x64xi1>
    %cst_83 = arith.constant 0.000000e+00 : bf16
    %222 = vector.broadcast %cst_83 : bf16 to vector<16x64xbf16>
    %223 = vector.shape_cast %221 : vector<1x64xi1> to vector<1x64xi1>
    %224 = vector.broadcast %223 : vector<1x64xi1> to vector<16x64xi1>
    %225 = arith.select %224, %220, %222 : vector<16x64xi1>, vector<16x64xbf16>
    %c288 = arith.constant 288 : index
    %c0_84 = arith.constant 0 : index
    %226 = vector.load %arg8[%c288, %c0_84] : memref<720x64xbf16, #tpu.memory_space<vmem>>, vector<16x64xbf16>
    tpu.vector_store %arg8[%c288, %c0_84], %225 {strides = array<i32>} : memref<720x64xbf16, #tpu.memory_space<vmem>>, vector<16x64xbf16>,
    %c0_85 = arith.constant 0 : index
    %c112_86 = arith.constant 112 : index
    %227 = vector.load %arg7[%c0_85, %c112_86] : memref<16x352xbf16, #tpu.memory_space<vmem>>, vector<16x64xbf16>
    %cst_87 = arith.constant 0.000000e+00 : bf16
    %228 = vector.broadcast %cst_87 : bf16 to vector<16x64xbf16>
    %229 = vector.shape_cast %56 : vector<1x64xi1> to vector<1x64xi1>
    %230 = vector.broadcast %229 : vector<1x64xi1> to vector<16x64xi1>
    %231 = arith.select %230, %227, %228 : vector<16x64xi1>, vector<16x64xbf16>
    %c304 = arith.constant 304 : index
    %c0_88 = arith.constant 0 : index
    %232 = vector.load %arg8[%c304, %c0_88] : memref<720x64xbf16, #tpu.memory_space<vmem>>, vector<16x64xbf16>
    tpu.vector_store %arg8[%c304, %c0_88], %231 {strides = array<i32>} : memref<720x64xbf16, #tpu.memory_space<vmem>>, vector<16x64xbf16>,
    %c0_89 = arith.constant 0 : index
    %c116 = arith.constant 116 : index
    %233 = vector.load %arg7[%c0_89, %c116] : memref<16x352xbf16, #tpu.memory_space<vmem>>, vector<16x64xbf16>
    %234 = arith.andi %56, %71 : vector<1x64xi1>
    %cst_90 = arith.constant 0.000000e+00 : bf16
    %235 = vector.broadcast %cst_90 : bf16 to vector<16x64xbf16>
    %236 = vector.shape_cast %234 : vector<1x64xi1> to vector<1x64xi1>
    %237 = vector.broadcast %236 : vector<1x64xi1> to vector<16x64xi1>
    %238 = arith.select %237, %233, %235 : vector<16x64xi1>, vector<16x64xbf16>
    %c320 = arith.constant 320 : index
    %c0_91 = arith.constant 0 : index
    %239 = vector.load %arg8[%c320, %c0_91] : memref<720x64xbf16, #tpu.memory_space<vmem>>, vector<16x64xbf16>
    tpu.vector_store %arg8[%c320, %c0_91], %238 {strides = array<i32>} : memref<720x64xbf16, #tpu.memory_space<vmem>>, vector<16x64xbf16>,
    %c0_92 = arith.constant 0 : index
    %c140 = arith.constant 140 : index
    %240 = vector.load %arg7[%c0_92, %c140] : memref<16x352xbf16, #tpu.memory_space<vmem>>, vector<16x64xbf16>
    %cst_93 = arith.constant 0.000000e+00 : bf16
    %241 = vector.broadcast %cst_93 : bf16 to vector<16x64xbf16>
    %242 = vector.shape_cast %61 : vector<1x64xi1> to vector<1x64xi1>
    %243 = vector.broadcast %242 : vector<1x64xi1> to vector<16x64xi1>
    %244 = arith.select %243, %240, %241 : vector<16x64xi1>, vector<16x64xbf16>
    %c336 = arith.constant 336 : index
    %c0_94 = arith.constant 0 : index
    %245 = vector.load %arg8[%c336, %c0_94] : memref<720x64xbf16, #tpu.memory_space<vmem>>, vector<16x64xbf16>
    tpu.vector_store %arg8[%c336, %c0_94], %244 {strides = array<i32>} : memref<720x64xbf16, #tpu.memory_space<vmem>>, vector<16x64xbf16>,
    %c0_95 = arith.constant 0 : index
    %c144_96 = arith.constant 144 : index
    %246 = vector.load %arg7[%c0_95, %c144_96] : memref<16x352xbf16, #tpu.memory_space<vmem>>, vector<16x64xbf16>
    %c352 = arith.constant 352 : index
    %c0_97 = arith.constant 0 : index
    %247 = vector.load %arg8[%c352, %c0_97] : memref<720x64xbf16, #tpu.memory_space<vmem>>, vector<16x64xbf16>
    tpu.vector_store %arg8[%c352, %c0_97], %246 {strides = array<i32>} : memref<720x64xbf16, #tpu.memory_space<vmem>>, vector<16x64xbf16>,
    %c0_98 = arith.constant 0 : index
    %c148 = arith.constant 148 : index
    %248 = vector.load %arg7[%c0_98, %c148] : memref<16x352xbf16, #tpu.memory_space<vmem>>, vector<16x64xbf16>
    %cst_99 = arith.constant 0.000000e+00 : bf16
    %249 = vector.broadcast %cst_99 : bf16 to vector<16x64xbf16>
    %250 = vector.shape_cast %71 : vector<1x64xi1> to vector<1x64xi1>
    %251 = vector.broadcast %250 : vector<1x64xi1> to vector<16x64xi1>
    %252 = arith.select %251, %248, %249 : vector<16x64xi1>, vector<16x64xbf16>
    %c368 = arith.constant 368 : index
    %c0_100 = arith.constant 0 : index
    %253 = vector.load %arg8[%c368, %c0_100] : memref<720x64xbf16, #tpu.memory_space<vmem>>, vector<16x64xbf16>
    tpu.vector_store %arg8[%c368, %c0_100], %252 {strides = array<i32>} : memref<720x64xbf16, #tpu.memory_space<vmem>>, vector<16x64xbf16>,
    %c0_101 = arith.constant 0 : index
    %c172 = arith.constant 172 : index
    %254 = vector.load %arg7[%c0_101, %c172] : memref<16x352xbf16, #tpu.memory_space<vmem>>, vector<16x64xbf16>
    %255 = arith.andi %66, %61 : vector<1x64xi1>
    %cst_102 = arith.constant 0.000000e+00 : bf16
    %256 = vector.broadcast %cst_102 : bf16 to vector<16x64xbf16>
    %257 = vector.shape_cast %255 : vector<1x64xi1> to vector<1x64xi1>
    %258 = vector.broadcast %257 : vector<1x64xi1> to vector<16x64xi1>
    %259 = arith.select %258, %254, %256 : vector<16x64xi1>, vector<16x64xbf16>
    %c384 = arith.constant 384 : index
    %c0_103 = arith.constant 0 : index
    %260 = vector.load %arg8[%c384, %c0_103] : memref<720x64xbf16, #tpu.memory_space<vmem>>, vector<16x64xbf16>
    tpu.vector_store %arg8[%c384, %c0_103], %259 {strides = array<i32>} : memref<720x64xbf16, #tpu.memory_space<vmem>>, vector<16x64xbf16>,
    %c0_104 = arith.constant 0 : index
    %c176_105 = arith.constant 176 : index
    %261 = vector.load %arg7[%c0_104, %c176_105] : memref<16x352xbf16, #tpu.memory_space<vmem>>, vector<16x64xbf16>
    %cst_106 = arith.constant 0.000000e+00 : bf16
    %262 = vector.broadcast %cst_106 : bf16 to vector<16x64xbf16>
    %263 = vector.shape_cast %66 : vector<1x64xi1> to vector<1x64xi1>
    %264 = vector.broadcast %263 : vector<1x64xi1> to vector<16x64xi1>
    %265 = arith.select %264, %261, %262 : vector<16x64xi1>, vector<16x64xbf16>
    %c400 = arith.constant 400 : index
    %c0_107 = arith.constant 0 : index
    %266 = vector.load %arg8[%c400, %c0_107] : memref<720x64xbf16, #tpu.memory_space<vmem>>, vector<16x64xbf16>
    tpu.vector_store %arg8[%c400, %c0_107], %265 {strides = array<i32>} : memref<720x64xbf16, #tpu.memory_space<vmem>>, vector<16x64xbf16>,
    %c0_108 = arith.constant 0 : index
    %c180 = arith.constant 180 : index
    %267 = vector.load %arg7[%c0_108, %c180] : memref<16x352xbf16, #tpu.memory_space<vmem>>, vector<16x64xbf16>
    %268 = arith.andi %66, %71 : vector<1x64xi1>
    %cst_109 = arith.constant 0.000000e+00 : bf16
    %269 = vector.broadcast %cst_109 : bf16 to vector<16x64xbf16>
    %270 = vector.shape_cast %268 : vector<1x64xi1> to vector<1x64xi1>
    %271 = vector.broadcast %270 : vector<1x64xi1> to vector<16x64xi1>
    %272 = arith.select %271, %267, %269 : vector<16x64xi1>, vector<16x64xbf16>
    %c416 = arith.constant 416 : index
    %c0_110 = arith.constant 0 : index
    %273 = vector.load %arg8[%c416, %c0_110] : memref<720x64xbf16, #tpu.memory_space<vmem>>, vector<16x64xbf16>
    tpu.vector_store %arg8[%c416, %c0_110], %272 {strides = array<i32>} : memref<720x64xbf16, #tpu.memory_space<vmem>>, vector<16x64xbf16>,
    %c0_111 = arith.constant 0 : index
    %c72 = arith.constant 72 : index
    %274 = vector.load %arg7[%c0_111, %c72] : memref<16x352xbf16, #tpu.memory_space<vmem>>, vector<16x64xbf16>
    %275 = arith.andi %76, %81 : vector<1x64xi1>
    %cst_112 = arith.constant 0.000000e+00 : bf16
    %276 = vector.broadcast %cst_112 : bf16 to vector<16x64xbf16>
    %277 = vector.shape_cast %275 : vector<1x64xi1> to vector<1x64xi1>
    %278 = vector.broadcast %277 : vector<1x64xi1> to vector<16x64xi1>
    %279 = arith.select %278, %274, %276 : vector<16x64xi1>, vector<16x64xbf16>
    %c432 = arith.constant 432 : index
    %c0_113 = arith.constant 0 : index
    %280 = vector.load %arg8[%c432, %c0_113] : memref<720x64xbf16, #tpu.memory_space<vmem>>, vector<16x64xbf16>
    tpu.vector_store %arg8[%c432, %c0_113], %279 {strides = array<i32>} : memref<720x64xbf16, #tpu.memory_space<vmem>>, vector<16x64xbf16>,
    %c0_114 = arith.constant 0 : index
    %c80_115 = arith.constant 80 : index
    %281 = vector.load %arg7[%c0_114, %c80_115] : memref<16x352xbf16, #tpu.memory_space<vmem>>, vector<16x64xbf16>
    %cst_116 = arith.constant 0.000000e+00 : bf16
    %282 = vector.broadcast %cst_116 : bf16 to vector<16x64xbf16>
    %283 = vector.shape_cast %76 : vector<1x64xi1> to vector<1x64xi1>
    %284 = vector.broadcast %283 : vector<1x64xi1> to vector<16x64xi1>
    %285 = arith.select %284, %281, %282 : vector<16x64xi1>, vector<16x64xbf16>
    %c448 = arith.constant 448 : index
    %c0_117 = arith.constant 0 : index
    %286 = vector.load %arg8[%c448, %c0_117] : memref<720x64xbf16, #tpu.memory_space<vmem>>, vector<16x64xbf16>
    tpu.vector_store %arg8[%c448, %c0_117], %285 {strides = array<i32>} : memref<720x64xbf16, #tpu.memory_space<vmem>>, vector<16x64xbf16>,
    %c0_118 = arith.constant 0 : index
    %c88 = arith.constant 88 : index
    %287 = vector.load %arg7[%c0_118, %c88] : memref<16x352xbf16, #tpu.memory_space<vmem>>, vector<16x64xbf16>
    %288 = arith.andi %76, %91 : vector<1x64xi1>
    %cst_119 = arith.constant 0.000000e+00 : bf16
    %289 = vector.broadcast %cst_119 : bf16 to vector<16x64xbf16>
    %290 = vector.shape_cast %288 : vector<1x64xi1> to vector<1x64xi1>
    %291 = vector.broadcast %290 : vector<1x64xi1> to vector<16x64xi1>
    %292 = arith.select %291, %287, %289 : vector<16x64xi1>, vector<16x64xbf16>
    %c464 = arith.constant 464 : index
    %c0_120 = arith.constant 0 : index
    %293 = vector.load %arg8[%c464, %c0_120] : memref<720x64xbf16, #tpu.memory_space<vmem>>, vector<16x64xbf16>
    tpu.vector_store %arg8[%c464, %c0_120], %292 {strides = array<i32>} : memref<720x64xbf16, #tpu.memory_space<vmem>>, vector<16x64xbf16>,
    %c0_121 = arith.constant 0 : index
    %c136_122 = arith.constant 136 : index
    %294 = vector.load %arg7[%c0_121, %c136_122] : memref<16x352xbf16, #tpu.memory_space<vmem>>, vector<16x64xbf16>
    %cst_123 = arith.constant 0.000000e+00 : bf16
    %295 = vector.broadcast %cst_123 : bf16 to vector<16x64xbf16>
    %296 = vector.shape_cast %81 : vector<1x64xi1> to vector<1x64xi1>
    %297 = vector.broadcast %296 : vector<1x64xi1> to vector<16x64xi1>
    %298 = arith.select %297, %294, %295 : vector<16x64xi1>, vector<16x64xbf16>
    %c480 = arith.constant 480 : index
    %c0_124 = arith.constant 0 : index
    %299 = vector.load %arg8[%c480, %c0_124] : memref<720x64xbf16, #tpu.memory_space<vmem>>, vector<16x64xbf16>
    tpu.vector_store %arg8[%c480, %c0_124], %298 {strides = array<i32>} : memref<720x64xbf16, #tpu.memory_space<vmem>>, vector<16x64xbf16>,
    %c0_125 = arith.constant 0 : index
    %c144_126 = arith.constant 144 : index
    %300 = vector.load %arg7[%c0_125, %c144_126] : memref<16x352xbf16, #tpu.memory_space<vmem>>, vector<16x64xbf16>
    %c496 = arith.constant 496 : index
    %c0_127 = arith.constant 0 : index
    %301 = vector.load %arg8[%c496, %c0_127] : memref<720x64xbf16, #tpu.memory_space<vmem>>, vector<16x64xbf16>
    tpu.vector_store %arg8[%c496, %c0_127], %300 {strides = array<i32>} : memref<720x64xbf16, #tpu.memory_space<vmem>>, vector<16x64xbf16>,
    %c0_128 = arith.constant 0 : index
    %c152_129 = arith.constant 152 : index
    %302 = vector.load %arg7[%c0_128, %c152_129] : memref<16x352xbf16, #tpu.memory_space<vmem>>, vector<16x64xbf16>
    %cst_130 = arith.constant 0.000000e+00 : bf16
    %303 = vector.broadcast %cst_130 : bf16 to vector<16x64xbf16>
    %304 = vector.shape_cast %91 : vector<1x64xi1> to vector<1x64xi1>
    %305 = vector.broadcast %304 : vector<1x64xi1> to vector<16x64xi1>
    %306 = arith.select %305, %302, %303 : vector<16x64xi1>, vector<16x64xbf16>
    %c512 = arith.constant 512 : index
    %c0_131 = arith.constant 0 : index
    %307 = vector.load %arg8[%c512, %c0_131] : memref<720x64xbf16, #tpu.memory_space<vmem>>, vector<16x64xbf16>
    tpu.vector_store %arg8[%c512, %c0_131], %306 {strides = array<i32>} : memref<720x64xbf16, #tpu.memory_space<vmem>>, vector<16x64xbf16>,
    %c0_132 = arith.constant 0 : index
    %c200 = arith.constant 200 : index
    %308 = vector.load %arg7[%c0_132, %c200] : memref<16x352xbf16, #tpu.memory_space<vmem>>, vector<16x64xbf16>
    %309 = arith.andi %86, %81 : vector<1x64xi1>
    %cst_133 = arith.constant 0.000000e+00 : bf16
    %310 = vector.broadcast %cst_133 : bf16 to vector<16x64xbf16>
    %311 = vector.shape_cast %309 : vector<1x64xi1> to vector<1x64xi1>
    %312 = vector.broadcast %311 : vector<1x64xi1> to vector<16x64xi1>
    %313 = arith.select %312, %308, %310 : vector<16x64xi1>, vector<16x64xbf16>
    %c528 = arith.constant 528 : index
    %c0_134 = arith.constant 0 : index
    %314 = vector.load %arg8[%c528, %c0_134] : memref<720x64xbf16, #tpu.memory_space<vmem>>, vector<16x64xbf16>
    tpu.vector_store %arg8[%c528, %c0_134], %313 {strides = array<i32>} : memref<720x64xbf16, #tpu.memory_space<vmem>>, vector<16x64xbf16>,
    %c0_135 = arith.constant 0 : index
    %c208_136 = arith.constant 208 : index
    %315 = vector.load %arg7[%c0_135, %c208_136] : memref<16x352xbf16, #tpu.memory_space<vmem>>, vector<16x64xbf16>
    %cst_137 = arith.constant 0.000000e+00 : bf16
    %316 = vector.broadcast %cst_137 : bf16 to vector<16x64xbf16>
    %317 = vector.shape_cast %86 : vector<1x64xi1> to vector<1x64xi1>
    %318 = vector.broadcast %317 : vector<1x64xi1> to vector<16x64xi1>
    %319 = arith.select %318, %315, %316 : vector<16x64xi1>, vector<16x64xbf16>
    %c544 = arith.constant 544 : index
    %c0_138 = arith.constant 0 : index
    %320 = vector.load %arg8[%c544, %c0_138] : memref<720x64xbf16, #tpu.memory_space<vmem>>, vector<16x64xbf16>
    tpu.vector_store %arg8[%c544, %c0_138], %319 {strides = array<i32>} : memref<720x64xbf16, #tpu.memory_space<vmem>>, vector<16x64xbf16>,
    %c0_139 = arith.constant 0 : index
    %c216 = arith.constant 216 : index
    %321 = vector.load %arg7[%c0_139, %c216] : memref<16x352xbf16, #tpu.memory_space<vmem>>, vector<16x64xbf16>
    %322 = arith.andi %86, %91 : vector<1x64xi1>
    %cst_140 = arith.constant 0.000000e+00 : bf16
    %323 = vector.broadcast %cst_140 : bf16 to vector<16x64xbf16>
    %324 = vector.shape_cast %322 : vector<1x64xi1> to vector<1x64xi1>
    %325 = vector.broadcast %324 : vector<1x64xi1> to vector<16x64xi1>
    %326 = arith.select %325, %321, %323 : vector<16x64xi1>, vector<16x64xbf16>
    %c560 = arith.constant 560 : index
    %c0_141 = arith.constant 0 : index
    %327 = vector.load %arg8[%c560, %c0_141] : memref<720x64xbf16, #tpu.memory_space<vmem>>, vector<16x64xbf16>
    tpu.vector_store %arg8[%c560, %c0_141], %326 {strides = array<i32>} : memref<720x64xbf16, #tpu.memory_space<vmem>>, vector<16x64xbf16>,
    %c0_142 = arith.constant 0 : index
    %c0_143 = arith.constant 0 : index
    %328 = vector.load %arg7[%c0_142, %c0_143] : memref<16x352xbf16, #tpu.memory_space<vmem>>, vector<16x64xbf16>
    %329 = arith.andi %96, %101 : vector<1x64xi1>
    %cst_144 = arith.constant 0.000000e+00 : bf16
    %330 = vector.broadcast %cst_144 : bf16 to vector<16x64xbf16>
    %331 = vector.shape_cast %329 : vector<1x64xi1> to vector<1x64xi1>
    %332 = vector.broadcast %331 : vector<1x64xi1> to vector<16x64xi1>
    %333 = arith.select %332, %328, %330 : vector<16x64xi1>, vector<16x64xbf16>
    %c576 = arith.constant 576 : index
    %c0_145 = arith.constant 0 : index
    %334 = vector.load %arg8[%c576, %c0_145] : memref<720x64xbf16, #tpu.memory_space<vmem>>, vector<16x64xbf16>
    tpu.vector_store %arg8[%c576, %c0_145], %333 {strides = array<i32>} : memref<720x64xbf16, #tpu.memory_space<vmem>>, vector<16x64xbf16>,
    %c0_146 = arith.constant 0 : index
    %c16_147 = arith.constant 16 : index
    %335 = vector.load %arg7[%c0_146, %c16_147] : memref<16x352xbf16, #tpu.memory_space<vmem>>, vector<16x64xbf16>
    %cst_148 = arith.constant 0.000000e+00 : bf16
    %336 = vector.broadcast %cst_148 : bf16 to vector<16x64xbf16>
    %337 = vector.shape_cast %96 : vector<1x64xi1> to vector<1x64xi1>
    %338 = vector.broadcast %337 : vector<1x64xi1> to vector<16x64xi1>
    %339 = arith.select %338, %335, %336 : vector<16x64xi1>, vector<16x64xbf16>
    %c592 = arith.constant 592 : index
    %c0_149 = arith.constant 0 : index
    %340 = vector.load %arg8[%c592, %c0_149] : memref<720x64xbf16, #tpu.memory_space<vmem>>, vector<16x64xbf16>
    tpu.vector_store %arg8[%c592, %c0_149], %339 {strides = array<i32>} : memref<720x64xbf16, #tpu.memory_space<vmem>>, vector<16x64xbf16>,
    %c0_150 = arith.constant 0 : index
    %c32_151 = arith.constant 32 : index
    %341 = vector.load %arg7[%c0_150, %c32_151] : memref<16x352xbf16, #tpu.memory_space<vmem>>, vector<16x64xbf16>
    %342 = arith.andi %96, %111 : vector<1x64xi1>
    %cst_152 = arith.constant 0.000000e+00 : bf16
    %343 = vector.broadcast %cst_152 : bf16 to vector<16x64xbf16>
    %344 = vector.shape_cast %342 : vector<1x64xi1> to vector<1x64xi1>
    %345 = vector.broadcast %344 : vector<1x64xi1> to vector<16x64xi1>
    %346 = arith.select %345, %341, %343 : vector<16x64xi1>, vector<16x64xbf16>
    %c608 = arith.constant 608 : index
    %c0_153 = arith.constant 0 : index
    %347 = vector.load %arg8[%c608, %c0_153] : memref<720x64xbf16, #tpu.memory_space<vmem>>, vector<16x64xbf16>
    tpu.vector_store %arg8[%c608, %c0_153], %346 {strides = array<i32>} : memref<720x64xbf16, #tpu.memory_space<vmem>>, vector<16x64xbf16>,
    %c0_154 = arith.constant 0 : index
    %c128_155 = arith.constant 128 : index
    %348 = vector.load %arg7[%c0_154, %c128_155] : memref<16x352xbf16, #tpu.memory_space<vmem>>, vector<16x64xbf16>
    %cst_156 = arith.constant 0.000000e+00 : bf16
    %349 = vector.broadcast %cst_156 : bf16 to vector<16x64xbf16>
    %350 = vector.shape_cast %101 : vector<1x64xi1> to vector<1x64xi1>
    %351 = vector.broadcast %350 : vector<1x64xi1> to vector<16x64xi1>
    %352 = arith.select %351, %348, %349 : vector<16x64xi1>, vector<16x64xbf16>
    %c624 = arith.constant 624 : index
    %c0_157 = arith.constant 0 : index
    %353 = vector.load %arg8[%c624, %c0_157] : memref<720x64xbf16, #tpu.memory_space<vmem>>, vector<16x64xbf16>
    tpu.vector_store %arg8[%c624, %c0_157], %352 {strides = array<i32>} : memref<720x64xbf16, #tpu.memory_space<vmem>>, vector<16x64xbf16>,
    %c0_158 = arith.constant 0 : index
    %c144_159 = arith.constant 144 : index
    %354 = vector.load %arg7[%c0_158, %c144_159] : memref<16x352xbf16, #tpu.memory_space<vmem>>, vector<16x64xbf16>
    %c640 = arith.constant 640 : index
    %c0_160 = arith.constant 0 : index
    %355 = vector.load %arg8[%c640, %c0_160] : memref<720x64xbf16, #tpu.memory_space<vmem>>, vector<16x64xbf16>
    tpu.vector_store %arg8[%c640, %c0_160], %354 {strides = array<i32>} : memref<720x64xbf16, #tpu.memory_space<vmem>>, vector<16x64xbf16>,
    %c0_161 = arith.constant 0 : index
    %c160_162 = arith.constant 160 : index
    %356 = vector.load %arg7[%c0_161, %c160_162] : memref<16x352xbf16, #tpu.memory_space<vmem>>, vector<16x64xbf16>
    %cst_163 = arith.constant 0.000000e+00 : bf16
    %357 = vector.broadcast %cst_163 : bf16 to vector<16x64xbf16>
    %358 = vector.shape_cast %111 : vector<1x64xi1> to vector<1x64xi1>
    %359 = vector.broadcast %358 : vector<1x64xi1> to vector<16x64xi1>
    %360 = arith.select %359, %356, %357 : vector<16x64xi1>, vector<16x64xbf16>
    %c656 = arith.constant 656 : index
    %c0_164 = arith.constant 0 : index
    %361 = vector.load %arg8[%c656, %c0_164] : memref<720x64xbf16, #tpu.memory_space<vmem>>, vector<16x64xbf16>
    tpu.vector_store %arg8[%c656, %c0_164], %360 {strides = array<i32>} : memref<720x64xbf16, #tpu.memory_space<vmem>>, vector<16x64xbf16>,
    %c0_165 = arith.constant 0 : index
    %c256_166 = arith.constant 256 : index
    %362 = vector.load %arg7[%c0_165, %c256_166] : memref<16x352xbf16, #tpu.memory_space<vmem>>, vector<16x64xbf16>
    %363 = arith.andi %106, %101 : vector<1x64xi1>
    %cst_167 = arith.constant 0.000000e+00 : bf16
    %364 = vector.broadcast %cst_167 : bf16 to vector<16x64xbf16>
    %365 = vector.shape_cast %363 : vector<1x64xi1> to vector<1x64xi1>
    %366 = vector.broadcast %365 : vector<1x64xi1> to vector<16x64xi1>
    %367 = arith.select %366, %362, %364 : vector<16x64xi1>, vector<16x64xbf16>
    %c672 = arith.constant 672 : index
    %c0_168 = arith.constant 0 : index
    %368 = vector.load %arg8[%c672, %c0_168] : memref<720x64xbf16, #tpu.memory_space<vmem>>, vector<16x64xbf16>
    tpu.vector_store %arg8[%c672, %c0_168], %367 {strides = array<i32>} : memref<720x64xbf16, #tpu.memory_space<vmem>>, vector<16x64xbf16>,
    %c0_169 = arith.constant 0 : index
    %c272_170 = arith.constant 272 : index
    %369 = vector.load %arg7[%c0_169, %c272_170] : memref<16x352xbf16, #tpu.memory_space<vmem>>, vector<16x64xbf16>
    %cst_171 = arith.constant 0.000000e+00 : bf16
    %370 = vector.broadcast %cst_171 : bf16 to vector<16x64xbf16>
    %371 = vector.shape_cast %106 : vector<1x64xi1> to vector<1x64xi1>
    %372 = vector.broadcast %371 : vector<1x64xi1> to vector<16x64xi1>
    %373 = arith.select %372, %369, %370 : vector<16x64xi1>, vector<16x64xbf16>
    %c688 = arith.constant 688 : index
    %c0_172 = arith.constant 0 : index
    %374 = vector.load %arg8[%c688, %c0_172] : memref<720x64xbf16, #tpu.memory_space<vmem>>, vector<16x64xbf16>
    tpu.vector_store %arg8[%c688, %c0_172], %373 {strides = array<i32>} : memref<720x64xbf16, #tpu.memory_space<vmem>>, vector<16x64xbf16>,
    %c0_173 = arith.constant 0 : index
    %c288_174 = arith.constant 288 : index
    %375 = vector.load %arg7[%c0_173, %c288_174] : memref<16x352xbf16, #tpu.memory_space<vmem>>, vector<16x64xbf16>
    %376 = arith.andi %106, %111 : vector<1x64xi1>
    %cst_175 = arith.constant 0.000000e+00 : bf16
    %377 = vector.broadcast %cst_175 : bf16 to vector<16x64xbf16>
    %378 = vector.shape_cast %376 : vector<1x64xi1> to vector<1x64xi1>
    %379 = vector.broadcast %378 : vector<1x64xi1> to vector<16x64xi1>
    %380 = arith.select %379, %375, %377 : vector<16x64xi1>, vector<16x64xbf16>
    %c704 = arith.constant 704 : index
    %c0_176 = arith.constant 0 : index
    %381 = vector.load %arg8[%c704, %c0_176] : memref<720x64xbf16, #tpu.memory_space<vmem>>, vector<16x64xbf16>
    tpu.vector_store %arg8[%c704, %c0_176], %380 {strides = array<i32>} : memref<720x64xbf16, #tpu.memory_space<vmem>>, vector<16x64xbf16>,
    %c0_177 = arith.constant 0 : index
    %c0_178 = arith.constant 0 : index
    %382 = vector.load %arg4[%c0_177, %c0_178] : memref<20x720xbf16, #tpu.memory_space<vmem>>, vector<20x720xbf16>
    %c0_179 = arith.constant 0 : index
    %c0_180 = arith.constant 0 : index
    %383 = vector.load %arg8[%c0_179, %c0_180] : memref<720x64xbf16, #tpu.memory_space<vmem>>, vector<720x64xbf16>
    %cst_181 = arith.constant dense<0.000000e+00> : vector<20x64xf32>
    %384 = tpu.matmul %382, %383, %cst_181 {dimension_numbers = #tpu.dot_dimension_numbers<[1], [0], [0], [1], [0, 0, 1, 1], [], []>} : vector<20x720xbf16>, vector<720x64xbf16>, vector<20x64xf32> -> vector<20x64xf32>
    %385 = arith.truncf %384 : vector<20x64xf32> to vector<20x64xbf16>
    %c0_182 = arith.constant 0 : index
    %c0_183 = arith.constant 0 : index
    %c0_184 = arith.constant 0 : index
    %386 = vector.load %arg5[%c0_182, %c0_183, %c0_184] : memref<1x20x64xbf16, #tpu.memory_space<vmem>>, vector<1x20x64xbf16>
    %387 = vector.shape_cast %386 : vector<1x20x64xbf16> to vector<20x64xbf16>
    %388 = vector.shape_cast %385 : vector<20x64xbf16> to vector<1x20x64xbf16>
    tpu.vector_store %arg5[%c0_182, %c0_183, %c0_184], %388 {strides = array<i32>} : memref<1x20x64xbf16, #tpu.memory_space<vmem>>, vector<1x20x64xbf16>,
    %cst_185 = arith.constant dense<0.000000e+00> : vector<20xf32>
    %389 = vector.multi_reduction <add>, %384, %cst_185 [1] : vector<20x64xf32> to vector<20xf32>
    %390 = vector.shape_cast %389 : vector<20xf32> to vector<20x1xf32>
    %c0_186 = arith.constant 0 : index
    %c0_187 = arith.constant 0 : index
    %c0_188 = arith.constant 0 : index
    %391 = vector.load %arg6[%c0_186, %c0_187, %c0_188] : memref<1x20x2xf32, #tpu.memory_space<vmem>>, vector<1x20x1xf32>
    %392 = vector.shape_cast %391 : vector<1x20x1xf32> to vector<20x1xf32>
    %393 = vector.shape_cast %390 : vector<20x1xf32> to vector<1x20x1xf32>
    tpu.vector_store %arg6[%c0_186, %c0_187, %c0_188], %393 {strides = array<i32>} : memref<1x20x2xf32, #tpu.memory_space<vmem>>, vector<1x20x1xf32>,
    %394 = arith.mulf %384, %384 : vector<20x64xf32>
    %cst_189 = arith.constant dense<0.000000e+00> : vector<20xf32>
    %395 = vector.multi_reduction <add>, %394, %cst_189 [1] : vector<20x64xf32> to vector<20xf32>
    %396 = vector.shape_cast %395 : vector<20xf32> to vector<20x1xf32>
    %c0_190 = arith.constant 0 : index
    %c0_191 = arith.constant 0 : index
    %c1 = arith.constant 1 : index
    %397 = vector.load %arg6[%c0_190, %c0_191, %c1] : memref<1x20x2xf32, #tpu.memory_space<vmem>>, vector<1x20x1xf32>
    %398 = vector.shape_cast %397 : vector<1x20x1xf32> to vector<20x1xf32>
    %399 = vector.shape_cast %396 : vector<20x1xf32> to vector<1x20x1xf32>
    tpu.vector_store %arg6[%c0_190, %c0_191, %c1], %399 {strides = array<i32>} : memref<1x20x2xf32, #tpu.memory_space<vmem>>, vector<1x20x1xf32>,
    return
  }
  func.func @transform_0(%arg0: i32) -> (i32, i32, i32) {
    %c0_i32 = arith.constant 0 : i32
    %c0_i32_0 = arith.constant 0 : i32
    %c0_i32_1 = arith.constant 0 : i32
    return %arg0, %c0_i32, %c0_i32_0 : i32, i32, i32
  }
  func.func @transform_1(%arg0: i32) -> (i32, i32) {
    %c0_i32 = arith.constant 0 : i32
    %c0_i32_0 = arith.constant 0 : i32
    %c0_i32_1 = arith.constant 0 : i32
    return %c0_i32, %c0_i32_0 : i32, i32
  }
  func.func @transform_2(%arg0: i32) -> (i32, i32) {
    %c0_i32 = arith.constant 0 : i32
    %c0_i32_0 = arith.constant 0 : i32
    %c0_i32_1 = arith.constant 0 : i32
    return %c0_i32, %c0_i32_0 : i32, i32
  }
  func.func @transform_3(%arg0: i32) -> (i32, i32) {
    %c0_i32 = arith.constant 0 : i32
    %c0_i32_0 = arith.constant 0 : i32
    %c0_i32_1 = arith.constant 0 : i32
    return %c0_i32, %c0_i32_0 : i32, i32
  }
  func.func @transform_4(%arg0: i32) -> (i32, i32, i32) {
    %c0_i32 = arith.constant 0 : i32
    %c0_i32_0 = arith.constant 0 : i32
    %c0_i32_1 = arith.constant 0 : i32
    return %arg0, %c0_i32, %c0_i32_0 : i32, i32, i32
  }
  func.func @transform_5(%arg0: i32) -> (i32, i32, i32) {
    %c0_i32 = arith.constant 0 : i32
    %c0_i32_0 = arith.constant 0 : i32
    %c0_i32_1 = arith.constant 0 : i32
    return %arg0, %c0_i32, %c0_i32_0 : i32, i32, i32
  }
}

</mosaic_0001>

<bundles_post_ra>
// kernel: downsampler_b_forward.3
= control target key start
LH: loop header
LB: loop body
LE: loop exit
PB: predicated region body
PF: predicated region fallthrough
CT: control target
= control target key end

     0   :  { %s425_s12 = smov 0   ;;  %s427_s13 = smov 0   ;;  %s476_s0 = inlined_call_operand.vmem [shape: bf16[2,20,64], index: 0, kind: input, shape index: {}]   ;;  %s477_s1 = inlined_call_operand.vmem [shape: f32[20,1], index: 1, kind: input, shape index: {}]   ;;  %s478_s2 = inlined_call_operand.vmem [shape: f32[20,1], index: 2, kind: input, shape index: {}]   ;;  %s479_s3 = inlined_call_operand.vmem [shape: f32[2,20,64], index: 3, kind: output, shape index: {}]  }
   0x1   :  { %s429_s14 = smov 0  }
   0x2 LB: > { %s25_s15 = sadd.s32 1, %s398_s13  ;;  %p342_p0 = scmp.ge.s32.totalorder %s402_s14, 1  ;;  %s402_s14 = sphi %s429_s14, %s13_s14   ;;  %s398_s13 = sphi %s427_s13, %s481_s13   ;;  %s394_s12 = sphi %s425_s12, %s480_s12  }
   0x3   : > { %p27_p1 = scmp.ge.s32.totalorder %s25_s15, 2  ;;  %p156_p2 = scmp.lt.s32.totalorder %s402_s14, 3 }
   0x5   : > { %s483_s15 = smov (%p27_p1, %s25_s15), 0  ;;  %p157_p3 = pnand %p342_p0, %p156_p2 }
   0x6   : > { %v210_v0 = vld [vmem:[%s477_s1 + $0x10] sm:$0xf] (!%p157_p3)  ;;  %v208_v1 = vld [vmem:[%s477_s1] sm:$0xff] (!%p157_p3)  ;;  %v404_v2 = vmov (!%p157_p3), 0   ;;  %v209_v4 = vld [vmem:[%s477_s1 + $0x8] sm:$0xff] (!%p157_p3)  ;;  %p186_p4 = scmp.lt.s32.totalorder (!%p157_p3), %s394_s12, 1 }
   0x7   : > { %160 = sbr.rel (%p157_p3) target bundleno = 148 (0x94), region = 32  ;;  %379 = vset.pattern.permute.xlu1 (!%p157_p3), %v404_v2  ;;  %378 = vset.pattern.permute.xlu0 (!%p157_p3), %v404_v2  ;;  %v229_v3 = vld [vmem:[%s478_s2] sm:$0xff] (!%p157_p3)  ;;  %v231_v5 = vld [vmem:[%s478_s2 + $0x10] sm:$0xf] (!%p157_p3)  ;;  %v230_v6 = vld [vmem:[%s478_s2 + $0x8] sm:$0xff] (!%p157_p3)  ;;  %vm250_vm0 = vcmask (!%p157_p3), 523264  }
   0x8   : > { %223 = vperm.xlu1 (!%p157_p3), %379, %v210_v0   ;;  %213 = vperm.xlu0 (!%p157_p3), %378, %v208_v1   ;;  %vm253_vm1 = vcmask (!%p157_p3), 519168  }
   0xc   : > { %234 = vperm.xlu1 (!%p157_p3), %379, %v229_v3   ;;  %218 = vperm.xlu0 (!%p157_p3), %378, %v209_v4  }
   0xe   : > { %s485_s12 = smov (!%p186_p4, %s394_s12), 1 }
   0xf   : > { %s351_s28 = smul.u32 12, %s485_s12 }
  0x10   : > { %244 = vperm.xlu1 %379, %v231_v5   ;;  %239 = vperm.xlu0 %378, %v230_v6   ;;  %s352_s5 = smul.u32 24, %s485_s12 }
  0x11   : > { %s193_s4 = scalar_lea.vmem %s476_s0, %s351_s28 }
  0x12   : > { %v348_v7 = vld [vmem:[%s193_s4] sm:$0xff]   ;;  %v204_v10 = vld [vmem:[%s193_s4 + $0x8] sm:$0x3]  ;;  %s201_s8 = scalar_lea.vmem %s479_s3, %s352_s5 }
  0x13   : > { %v349_v8 = vunpack.c.l.bf16 %v348_v7  ;;  %v207_v12 = vunpack.c.l.bf16 %v204_v10  ;;  %v350_v14 = vunpack.c.h.bf16 %v348_v7 }
  0x87   : > { %v224_v9 = vpop.permute.xlu1 %223  ;;  %v214_v11 = vpop.permute.xlu0 %213 }
  0x88   : > { %v226_v13 = vmul.f32 %v349_v8, %v214_v11  ;;  %v228_v18 = vmul.f32 %v224_v9, %v207_v12 }
  0x8b   : > { %v235_v15 = vpop.permute.xlu1 %234  ;;  %v219_v16 = vpop.permute.xlu0 %218 }
  0x8c   : > { %v247_v17 = vadd.f32 %v235_v15, %v226_v13  ;;  %v227_v19 = vmul.f32 %v350_v14, %v219_v16 }
  0x8e   : > { %251 = vst.msk [vmem:[%s201_s8] sm:$0xff] %vm250_vm0, %v247_v17 }
  0x8f   : > { %v245_v20 = vpop.permute.xlu1 %244  ;;  %v240_v21 = vpop.permute.xlu0 %239 }
  0x90   : > { %v249_v22 = vadd.f32 %v245_v20, %v228_v18  ;;  %v248_v23 = vadd.f32 %v240_v21, %v227_v19 }
  0x92   : > { %254 = vst.msk [vmem:[%s201_s8 + $0x10] sm:$0xf] %vm253_vm1, %v249_v22 }
  0x93   : > { %252 = vst.msk [vmem:[%s201_s8 + $0x8] sm:$0xff] %vm250_vm0, %v248_v23 }
  0x94 PF: > { %s13_s14 = sadd.s32 1, %s402_s14   ;;  %s480_s12 = smov %s398_s13 }
  0x95   : > { %p10_p5 = scmp.ge.s32.totalorder %s13_s14, 4   ;;  %s481_s13 = smov %s483_s15 }
  0x97   :  { %12 = sbr.rel (!%p10_p5) target bundleno = 2 (0x2), region = 62 }

// kernel: downsampler_b_forward.2
= control target key start
LH: loop header
LB: loop body
LE: loop exit
PB: predicated region body
PF: predicated region fallthrough
CT: control target
= control target key end

     0   :  { %s1987_s18 = smov 0   ;;  %s2740_s0 = inlined_call_operand.vmem [shape: bf16[2,40,64], index: 0, kind: input, shape index: {}]   ;;  %s2741_s1 = inlined_call_operand.vmem [shape: s32[1,64], index: 1, kind: input, shape index: {}]   ;;  %s2742_s2 = inlined_call_operand.vmem [shape: bf16[16,40], index: 2, kind: input, shape index: {}]   ;;  %s2743_s3 = inlined_call_operand.vmem [shape: bf16[20,720], index: 3, kind: input, shape index: {}]   ;;  %s2744_s4 = inlined_call_operand.vmem [shape: bf16[2,20,64], index: 4, kind: output, shape index: {0}]   ;;  %s2745_s5 = inlined_call_operand.vmem [shape: f32[2,20,2], index: 5, kind: output, shape index: {1}]  }
   0x1 LB: > { %s1719_s19 = sadd.s32 4294967295, %s1908_s18   ;;  %p1723_p0 = scmp.ge.s32.totalorder %s1908_s18, 1  ;;  %s1908_s18 = sphi %s1987_s18, %s16_s18  }
   0x2   : > { %p190_p1 = scmp.lt.s32.totalorder %s1908_s18, 3 }
   0x4   : > { %p191_p2 = pnand %p1723_p0, %p190_p1 }
   0x5   : > { %p223_p3 = scmp.lt.s32.totalorder (!%p191_p2), %s1719_s19, 1  ;;  %v1910_v0 = vmov (!%p191_p2), 0.0   ;;  %vm1911_vm0 = vmmov (!%p191_p2), 0   ;;  %v331_v1 = vlaneseq (!%p191_p2)  ;;  %v1912_v2 = vmov (!%p191_p2), 0   ;;  %v2002_v3 = vld [vmem:[%s2741_s1] sm:$0x1] (!%p191_p2) }
   0x6   : > { %194 = sbr.rel (%p191_p2) target bundleno = 956 (0x3bc), region = 36  ;;  %1814 = vmatprep.subr.bf16.mxu1 (!%p191_p2), %v1910_v0  ;;  %1820 = vmatprep.mubr.msk.bf16.mxu1 (!%p191_p2), %vm1911_vm0, %v1910_v0  ;;  %317 = vst [vmem:[#allocation2] sm:$0xff] (!%p191_p2), %v1912_v2  ;;  %vm322_vm1 = vcmask (!%p191_p2), 785408   ;;  %vm337_vm2 = vcmp.ge.s32.totalorder (!%p191_p2), %v2002_v3, 1  ;;  %vm338_vm3 = vcmp.lt.s32.totalorder (!%p191_p2), %v2002_v3, 9  ;;  %vm349_vm5 = vcmp.ge.s32.totalorder (!%p191_p2), %v2002_v3, 2 }
   0x7   : > { %v398_v4 = vshrl.u32 (!%p191_p2), %v331_v1, 7  ;;  %v2006_v5 = vand.u32 (!%p191_p2), 127, %v331_v1  ;;  %323 = vst.msk [vmem:[#allocation2 + $0x10] sm:$0xff] (!%p191_p2), %vm322_vm1, %v1912_v2  ;;  %vm2010_vm4 = vmand (!%p191_p2), %vm337_vm2, %vm338_vm3  ;;  %vm350_vm6 = vcmp.lt.s32.totalorder (!%p191_p2), %v2002_v3, 10  ;;  %vm272_vm1 = vcmask (!%p191_p2), 1043456   ;;  %s1913_s26 = smov (!%p191_p2), 15  }
   0x8   : > { %v460_v8 = vsel (!%p191_p2), %vm2010_vm4, 1, %v1912_v2  ;;  %vm2033_vm12 = vmand (!%p191_p2), %vm349_vm5, %vm350_vm6  ;;  %vm343_vm5 = vcmp.ge.s32.totalorder (!%p191_p2), %v2002_v3, 4294967295  ;;  %vm344_vm6 = vcmp.lt.s32.totalorder (!%p191_p2), %v2002_v3, 7  ;;  %v1885_v26 = vld [vmem:[%s2742_s2] sm:$0xff] (!%p191_p2)   ;;  %s1914_s29 = smov (!%p191_p2), 7   ;;  %s1915_s30 = smov (!%p191_p2), 126  }
   0x9   : > { %v2016_v7 = vsub.s32 (!%p191_p2), 0, %v398_v4  ;;  %vm334_vm7 = vcmp.ge.s32.totalorder (!%p191_p2), %v2006_v5, 8  ;;  %vm335_vm8 = vcmp.lt.s32.totalorder (!%p191_p2), %v2006_v5, 72  ;;  %vm346_vm10 = vcmp.ge.s32.totalorder (!%p191_p2), %v2006_v5, 16  ;;  %s1916_s6 = smov (!%p191_p2), 8   ;;  %s1917_s7 = smov (!%p191_p2), 9  }
   0xa   : > { %vm2026_vm9 = vmand (!%p191_p2), %vm334_vm7, %vm335_vm8  ;;  %vm347_vm11 = vcmp.lt.s32.totalorder (!%p191_p2), %v2006_v5, 80  ;;  %v639_v36 = vsel (!%p191_p2), %vm2033_vm12, 1, %v1912_v2  ;;  %s1918_s8 = smov (!%p191_p2), 24   ;;  %s1919_s9 = smov (!%p191_p2), 25  }
   0xb   : > { %v464_v11 = vrot.slane (!%p191_p2), %v460_v8, %v2016_v7  ;;  %vm395_vm14 = vmand (!%p191_p2), %vm2026_vm9, %vm2010_vm4  ;;  %v1093_v21 = vrot.slane (!%p191_p2), %v1912_v2, %v2016_v7  ;;  %v643_v44 = vrot.slane (!%p191_p2), %v639_v36, %v2016_v7  ;;  %s1920_s10 = smov (!%p191_p2), 72   ;;  %s1921_s11 = smov (!%p191_p2), 2  }
   0xc   : > { %v396_v15 = vsel (!%p191_p2), %vm395_vm14, 1, %v1912_v2  ;;  %vm2044_vm2 = vmand (!%p191_p2), %vm346_vm10, %vm347_vm11  ;;  %vm379_vm11 = vcmp.ge.s32.totalorder (!%p191_p2), %v2002_v3, 4294967288  ;;  %s1922_s12 = smov (!%p191_p2), 23   ;;  %s1923_s13 = smov (!%p191_p2), 14  }
   0xd   : > { %s2835_s19 = smov (!%p223_p3, %s1719_s19), 1  ;;  %vm465_vm13 = vcmp.eq.s32.totalorder %v464_v11, 1  ;;  %v400_v17 = vrot.slane %v396_v15, %v2016_v7  ;;  %vm575_vm3 = vmand %vm2044_vm2, %vm2033_vm12  ;;  %s1924_s14 = smov 30  }
   0xe   : > { %s1824_s22 = smul.u32 20, %s2835_s19  ;;  %vm466_vm15 = vmpackc.low %vm465_vm13, %vm465_vm13  ;;  %v576_v20 = vsel %vm575_vm3, 1, %v1912_v2  ;;  %vm380_vm13 = vcmp.lt.s32.totalorder %v2002_v3, 0  ;;  %v2120_v46 = vld [vmem:[#allocation2 + $0x10] sm:$0xff]  ;;  %s1925_s15 = smov 17  }
   0xf   : > { %v467_v16 = vsel %vm466_vm15, 65537, %v1912_v2  ;;  %vm401_vm7 = vcmp.eq.s32.totalorder %v400_v17, 1  ;;  %v580_v23 = vrot.slane %v576_v20, %v2016_v7  ;;  %vm2060_vm10 = vmand %vm343_vm5, %vm344_vm6  ;;  %vm1094_vm5 = vcmp.eq.s32.totalorder %v1093_v21, 1  ;;  %s1926_s16 = smov 88   ;;  %s1927_s17 = smov 18  }
  0x10   : > { %s227_s25 = scalar_lea.vmem %s2740_s0, %s1824_s22  ;;  %v471_v19 = vrot.slane %v467_v16, %v2016_v7  ;;  %vm402_vm8 = vmpackc.low %vm401_vm7, %vm401_vm7  ;;  %v488_v41 = vsel %vm2060_vm10, 1, %v1912_v2  ;;  %s1928_s20 = smov 32  }
  0x11   : > { %v1882_v10 = vld [vmem:[%s227_s25] sm:$0xff]   ;;  %v1883_v13 = vld [vmem:[%s227_s25 + $0x8] sm:$0xff]   ;;  %v1884_v14 = vld [vmem:[%s227_s25 + $0x10] ss:$0 sps:$4 sm:$0xff]   ;;  %v403_v24 = vsel %vm402_vm8, 65537, %v1912_v2  ;;  %vm581_vm14 = vcmp.eq.s32.totalorder %v580_v23, 1  ;;  %v492_v51 = vrot.slane %v488_v41, %v2016_v7 }
  0x12   : > { %1815 = vmatpush3.bf16.msra.mxu1 %v1882_v10  ;;  %v274_v22 = vsel %vm272_vm1, %v1884_v14, 0  ;;  %472 = vrot.lane.b32.xlu1 %v471_v19, %s1913_s26  ;;  %v407_v27 = vrot.slane %v403_v24, %v2016_v7  ;;  %vm437_vm15 = vmand %vm2026_vm9, %vm2060_vm10  ;;  %vm2746_vm1 = vcmask 326656   ;;  %vm2748_vm8 = vcmp.lt.s32.totalorder %v2006_v5, 56  ;;  %s1929_s21 = smov 80   ;;  %s1930_s22 = smov 34  }
  0x13   : > { %1816 = vmatprep.subr.bf16.mxu1 %v1910_v0  ;;  %vm582_vm3 = vmpackc.low %vm581_vm14, %vm581_vm14  ;;  %v438_v28 = vsel %vm437_vm15, 1, %v1912_v2  ;;  %vm356_vm15 = vcmp.lt.s32.totalorder %v2002_v3, 6  ;;  %s1931_s23 = smov 108   ;;  %s1932_s24 = smov 44  }
  0x14   : > { %v583_v29 = vsel %vm582_vm3, 65537, %v1912_v2  ;;  %v442_v30 = vrot.slane %v438_v28, %v2016_v7  ;;  %vm2079_vm6 = vmand %vm379_vm11, %vm380_vm13  ;;  %s1933_s25 = smov 112   ;;  %s1934_s26 = smov 48  }
  0x15   : > { %v587_v32 = vrot.slane %v583_v29, %v2016_v7  ;;  %v1065_v33 = vsel %vm2079_vm6, 1, %v1912_v2  ;;  %vm421_vm7 = vmpackc.low %vm2026_vm9, %vm2026_vm9  ;;  %vm355_vm9 = vcmp.ge.s32.totalorder %v2002_v3, 4294967294  ;;  %s1935_s27 = smov 116   ;;  %s1936_s28 = smov 12  }
  0x16   : > { %1817 = vmatpush3.bf16.msra.mxu1 %v1883_v13  ;;  %408 = vrot.lane.b32.xlu1 %v407_v27, %s1914_s29  ;;  %vm443_vm11 = vcmp.eq.s32.totalorder %v442_v30, 1  ;;  %v1069_v34 = vrot.slane %v1065_v33, %v2016_v7  ;;  %v422_v35 = vsel %vm421_vm7, 65537, %v1912_v2  ;;  %vm1095_vm13 = vmpackc.low %vm1094_vm5, %vm1094_vm5  ;;  %vm2747_vm7 = vcmask 523264   ;;  %s1937_s29 = smov 16  }
  0x17   : > { %1818 = vmatprep.subr.bf16.mxu1 %v1910_v0  ;;  %vm444_vm14 = vmpackc.low %vm443_vm11, %vm443_vm11  ;;  %v426_v37 = vrot.slane %v422_v35, %v2016_v7  ;;  %v1096_v38 = vsel %vm1095_vm13, 65537, %v1912_v2  ;;  %1184 = vst.msk [vmem:[#allocation3 + $0x120] sm:$0xff] %vm2747_vm7, %v1912_v2 }
  0x18   : > { %v445_v39 = vsel %vm444_vm14, 65537, %v1912_v2  ;;  %vm1070_vm3 = vcmp.eq.s32.totalorder %v1069_v34, 1  ;;  %v2105_v40 = vrot.slane %v1096_v38, %v2016_v7  ;;  %vm551_vm5 = vmand %vm2748_vm8, %vm2060_vm10  ;;  %vm353_vm14 = vcmp.lt.s32.totalorder %v2006_v5, 48 }
  0x19   : > { %v449_v42 = vrot.slane %v445_v39, %v2016_v7  ;;  %vm1071_vm11 = vmpackc.low %vm1070_vm3, %vm1070_vm3  ;;  %427 = vrot.lane.b32.xlu0 %v426_v37, %s1916_s6  ;;  %v552_v43 = vsel %vm551_vm5, 1, %v1912_v2  ;;  %vm2152_vm5 = vcmp.eq.s32.totalorder %v643_v44, 1 }
  0x1a   : > { %1819 = vmatpush3.bf16.msra.mxu1 %v274_v22  ;;  %588 = vrot.lane.b32.xlu1 %v587_v32, %s1915_s30  ;;  %v1072_v45 = vsel %vm1071_vm11, 65537, %v1912_v2  ;;  %vm1182_vm13 = vcmp.ne.s16.totalorder %v2105_v40, 0  ;;  %v556_v47 = vrot.slane %v552_v43, %v2016_v7  ;;  %vm510_vm10 = vmand %vm2748_vm8, %vm2010_vm4 }
  0x1b   : > { %1534 = vmatprep.subr.bf16.mxu1 %v1912_v2  ;;  %v1285_v48 = vsel %vm1182_vm13, %v2120_v46, 0  ;;  %v511_v49 = vsel %vm510_vm10, 1, %v1912_v2  ;;  %vm2134_vm3 = vmand %vm355_vm9, %vm356_vm15  ;;  %v1076_v52 = vrot.slane %v1072_v45, %v2016_v7 }
  0x1c   : > { %1286 = vst.msk [vmem:[#allocation3 + $0x150] sm:$0xff] %vm2747_vm7, %v1285_v48  ;;  %vm557_vm4 = vcmp.eq.s32.totalorder %v556_v47, 1  ;;  %v515_v53 = vrot.slane %v511_v49, %v2016_v7  ;;  %vm616_vm9 = vmand %vm2044_vm2, %vm2134_vm3  ;;  %v667_v54 = vsel %vm2134_vm3, 1, %v1912_v2 }
  0x1d   : > { %1821 = vmatmul.mubr.msk.bf16.vlgmr.msra.gmra.mrb[0].mxu1 %vm2746_vm1, %v1885_v26  ;;  %vm558_vm15 = vmpackc.low %vm557_vm4, %vm557_vm4  ;;  %v617_v55 = vsel %vm616_vm9, 1, %v1912_v2  ;;  %v671_v60 = vrot.slane %v667_v54, %v2016_v7  ;;  %vm2172_vm4 = vcmp.eq.s32.totalorder %v492_v51, 1 }
  0x1e   : > { %450 = vrot.lane.b32.xlu1 %v449_v42, %s1917_s7  ;;  %v559_v57 = vsel %vm558_vm15, 65537, %v1912_v2  ;;  %vm2157_vm11 = vcmp.eq.s32.totalorder %v515_v53, 1  ;;  %v621_v59 = vrot.slane %v617_v55, %v2016_v7  ;;  %vm689_vm13 = vmand %vm353_vm14, %vm2033_vm12  ;;  %s1939_s7 = smov 40  }
  0x1f   : > { %v563_v61 = vrot.slane %v559_v57, %v2016_v7  ;;  %vm517_vm10 = vmpackc.low %vm2157_vm11, %vm2157_vm11  ;;  %v690_v62 = vsel %vm689_vm13, 1, %v1912_v2  ;;  %vm2187_vm1 = vcmp.eq.s32.totalorder %v671_v60, 1 }
  0x20   : > { %vm622_vm9 = vcmp.eq.s32.totalorder %v621_v59, 1  ;;  %v694_v0 = vrot.slane %v690_v62, %v2016_v7  ;;  %vm645_vm12 = vmpackc.low %vm2152_vm5, %vm2152_vm5  ;;  %v518_v1 = vsel %vm517_vm10, 65537, %v1912_v2  ;;  %vm358_vm10 = vcmp.ge.s32.totalorder %v2006_v5, 32 }
  0x21   : > { %564 = vrot.lane.b32.xlu0 %v563_v61, %s1919_s9  ;;  %vm623_vm15 = vmpackc.low %vm622_vm9, %vm622_vm9  ;;  %v646_v6 = vsel %vm645_vm12, 65537, %v1912_v2  ;;  %v522_v10 = vrot.slane %v518_v1, %v2016_v7  ;;  %vm359_vm9 = vcmp.lt.s32.totalorder %v2006_v5, 96  ;;  %s1941_s9 = smov 52  }
  0x22   : > { %1077 = vrot.lane.b32.xlu1 %v1076_v52, %s1918_s8  ;;  %v624_v4 = vsel %vm623_vm15, 65537, %v1912_v2  ;;  %vm695_vm11 = vcmp.eq.s32.totalorder %v694_v0, 1  ;;  %vm494_vm13 = vmpackc.low %vm2172_vm4, %vm2172_vm4  ;;  %v650_v12 = vrot.slane %v646_v6, %v2016_v7  ;;  %vm361_vm15 = vcmp.ge.s32.totalorder %v2002_v3, 4 }
  0x23   : > { %v628_v9 = vrot.slane %v624_v4, %v2016_v7  ;;  %vm696_vm5 = vmpackc.low %vm695_vm11, %vm695_vm11  ;;  %vm362_vm11 = vcmp.lt.s32.totalorder %v2002_v3, 12  ;;  %v495_v13 = vsel %vm494_vm13, 65537, %v1912_v2  ;;  %vm365_vm4 = vcmp.lt.s32.totalorder %v2006_v5, 32 }
  0x24   : > { %v697_v11 = vsel %vm696_vm5, 65537, %v1912_v2  ;;  %vm673_vm12 = vmpackc.low %vm2187_vm1, %vm2187_vm1  ;;  %v499_v20 = vrot.slane %v495_v13, %v2016_v7 }
  0x25   : > { %629 = vrot.lane.b32.xlu0 %v628_v9, %s1921_s11  ;;  %vm730_vm5 = vmand %vm353_vm14, %vm2134_vm3  ;;  %v701_v16 = vrot.slane %v697_v11, %v2016_v7  ;;  %v674_v21 = vsel %vm673_vm12, 65537, %v1912_v2  ;;  %vm2780_vm12 = vcmp.lt.s32.totalorder %v2006_v5, 56 }
  0x26   : > { %1101 = vrot.lane.b32.xlu1 %v2105_v40, %s1920_s10  ;;  %v731_v14 = vsel %vm730_vm5, 1, %v1912_v2  ;;  %vm2216_vm7 = vmand %vm358_vm10, %vm359_vm9  ;;  %v678_v26 = vrot.slane %v674_v21, %v2016_v7 }
  0x27   : > { %v735_v17 = vrot.slane %v731_v14, %v2016_v7  ;;  %vm2222_vm8 = vmand %vm361_vm15, %vm362_vm11 }
  0x28   : > { %vm754_vm3 = vmand %vm2216_vm7, %vm2222_vm8  ;;  %v838_v52 = vsel %vm2222_vm8, 1, %v1912_v2 }
  0x29   : > { %651 = vrot.lane.b32.xlu0 %v650_v12, %s1923_s13  ;;  %vm714_vm13 = vmpackc.low %vm353_vm14, %vm353_vm14  ;;  %v755_v22 = vsel %vm754_vm3, 1, %v1912_v2  ;;  %vm2244_vm9 = vcmp.eq.s32.totalorder %v735_v17, 1  ;;  %v842_v54 = vrot.slane %v838_v52, %v2016_v7  ;;  %s1944_s13 = smov 120  }
  0x2a   : > { %523 = vrot.lane.b32.xlu1 %v522_v10, %s1922_s12  ;;  %vm1119_vm10 = vmpackc.low %vm1911_vm0, %vm1911_vm0  ;;  %v759_v24 = vrot.slane %v755_v22, %v2016_v7  ;;  %v715_v25 = vsel %vm714_vm13, 65537, %v1912_v2  ;;  %s1943_s12 = smov 103  }
  0x2b   : > { %vm888_vm14 = vmand %vm365_vm4, %vm2222_vm8  ;;  %v1120_v28 = vsel %vm1119_vm10, 65537, %v1912_v2  ;;  %v719_v32 = vrot.slane %v715_v25, %v2016_v7  ;;  %vm367_vm10 = vcmp.ge.s32.totalorder %v2002_v3, 4294967292 }
  0x2c   : > { %v889_v27 = vsel %vm888_vm14, 1, %v1912_v2  ;;  %vm737_vm0 = vmpackc.low %vm2244_vm9, %vm2244_vm9  ;;  %vm2261_vm1 = vcmp.eq.s32.totalorder %v759_v24, 1  ;;  %v2276_v34 = vrot.slane %v1120_v28, %v2016_v7  ;;  %vm368_vm9 = vcmp.lt.s32.totalorder %v2002_v3, 4 }
  0x2d   : > { %500 = vrot.lane.b32.xlu0 %v499_v20, %s1925_s15  ;;  %v893_v29 = vrot.slane %v889_v27, %v2016_v7  ;;  %vm535_vm15 = vmpackc.low %vm2780_vm12, %vm2780_vm12  ;;  %v738_v35 = vsel %vm737_vm0, 65537, %v1912_v2  ;;  %s1946_s15 = smov 119  }
  0x2e   : > { %702 = vrot.lane.b32.xlu1 %v701_v16, %s1924_s14  ;;  %vm761_vm5 = vmpackc.low %vm2261_vm1, %vm2261_vm1  ;;  %v536_v36 = vsel %vm535_vm15, 65537, %v1912_v2  ;;  %v742_v37 = vrot.slane %v738_v35, %v2016_v7  ;;  %s1945_s14 = smov 121  }
  0x2f   : > { %vm2271_vm11 = vcmp.eq.s32.totalorder %v893_v29, 1  ;;  %v762_v38 = vsel %vm761_vm5, 65537, %v1912_v2  ;;  %v540_v39 = vrot.slane %v536_v36, %v2016_v7  ;;  %vm786_vm13 = vmpackc.low %vm2216_vm7, %vm2216_vm7  ;;  %vm843_vm5 = vcmp.eq.s32.totalorder %v842_v54, 1 }
  0x30   : > { %vm895_vm3 = vmpackc.low %vm2271_vm11, %vm2271_vm11  ;;  %v766_v42 = vrot.slane %v762_v38, %v2016_v7  ;;  %v787_v44 = vsel %vm786_vm13, 65537, %v1912_v2  ;;  %vm374_vm11 = vcmp.lt.s32.totalorder %v2002_v3, 16 }
  0x31   : > { %679 = vrot.lane.b32.xlu0 %v678_v26, %s1927_s17  ;;  %v896_v41 = vsel %vm895_vm3, 65537, %v1912_v2  ;;  %v791_v45 = vrot.slane %v787_v44, %v2016_v7  ;;  %vm2307_vm14 = vmand %vm367_vm10, %vm368_vm9  ;;  %vm2749_vm9 = vcmask 130048   ;;  %s1949_s17 = smov 110  }
  0x32   : > { %1154 = vrot.lane.b32.xlu1 %v2105_v40, %s1926_s16  ;;  %v900_v43 = vrot.slane %v896_v41, %v2016_v7  ;;  %vm809_vm0 = vmand %vm2216_vm7, %vm2307_vm14  ;;  %vm373_vm7 = vcmp.ge.s32.totalorder %v2002_v3, 8  ;;  %319 = vst.msk [vmem:[#allocation2 + $0x8] sm:$0xff] %vm2749_vm9, %v1912_v2 }
  0x33   : > { %v810_v48 = vsel %vm809_vm0, 1, %v1912_v2  ;;  %vm913_vm1 = vmpackc.low %vm365_vm4, %vm365_vm4  ;;  %vm320_vm0 = vcmask 1048192  }
  0x34   : > { %v814_v49 = vrot.slane %v810_v48, %v2016_v7  ;;  %v914_v50 = vsel %vm913_vm1, 65537, %v1912_v2  ;;  %vm2331_vm3 = vmand %vm373_vm7, %vm374_vm11  ;;  %321 = vst.msk [vmem:[#allocation2 + $0x8] sm:$0xff] %vm320_vm0, %v1912_v2  ;;  %vm392_vm0 = vcmp.lt.s32.totalorder %v2002_v3, 4294967288 }
  0x35   : > { %1125 = vrot.lane.b32.xlu0 %v2276_v34, %s1929_s21  ;;  %v918_v51 = vrot.slane %v914_v50, %v2016_v7  ;;  %vm844_vm8 = vmpackc.low %vm843_vm5, %vm843_vm5  ;;  %v1037_v57 = vsel %vm2331_vm3, 1, %v1912_v2  ;;  %vm370_vm5 = vcmp.ge.s32.totalorder %v2006_v5, 64 }
  0x36   : > { %720 = vrot.lane.b32.xlu1 %v719_v32, %s1928_s20  ;;  %vm815_vm12 = vcmp.eq.s32.totalorder %v814_v49, 1  ;;  %v845_v58 = vsel %vm844_vm8, 65537, %v1912_v2  ;;  %v1041_v59 = vrot.slane %v1037_v57, %v2016_v7  ;;  %vm929_vm11 = vmand %vm365_vm4, %vm2307_vm14 }
  0x37   : > { %vm816_vm15 = vmpackc.low %vm815_vm12, %vm815_vm12  ;;  %v849_v60 = vrot.slane %v845_v58, %v2016_v7  ;;  %v930_v25 = vsel %vm929_vm11, 1, %v1912_v2 }
  0x38   : > { %v817_v53 = vsel %vm816_vm15, 65537, %v1912_v2  ;;  %vm1042_vm13 = vcmp.eq.s32.totalorder %v1041_v59, 1  ;;  %vm953_vm8 = vmand %vm370_vm5, %vm2331_vm3  ;;  %v934_v26 = vrot.slane %v930_v25, %v2016_v7  ;;  %vm391_vm3 = vcmp.ge.s32.totalorder %v2002_v3, 4294967280 }
  0x39   : > { %541 = vrot.lane.b32.xlu0 %v540_v39, %s1918_s8  ;;  %v821_v55 = vrot.slane %v817_v53, %v2016_v7  ;;  %vm1043_vm10 = vmpackc.low %vm1042_vm13, %vm1042_vm13  ;;  %s1940_s8 = smov 20   ;;  %v954_v27 = vsel %vm953_vm8, 1, %v1912_v2 }
  0x3a   : > { %743 = vrot.lane.b32.xlu1 %v742_v37, %s1930_s22  ;;  %v1044_v61 = vsel %vm1043_vm10, 65537, %v1912_v2  ;;  %vm935_vm13 = vcmp.eq.s32.totalorder %v934_v26, 1  ;;  %v958_v29 = vrot.slane %v954_v27, %v2016_v7  ;;  %vm1008_vm4 = vmand %vm370_vm5, %vm2079_vm6  ;;  %s1952_s22 = smov 98  }
  0x3b   : > { %v1048_v62 = vrot.slane %v1044_v61, %v2016_v7  ;;  %vm936_vm10 = vmpackc.low %vm935_vm13, %vm935_vm13  ;;  %v1009_v36 = vsel %vm1008_vm4, 1, %v1912_v2 }
  0x3c   : > { %vm959_vm11 = vcmp.eq.s32.totalorder %v958_v29, 1  ;;  %v937_v37 = vsel %vm936_vm10, 65537, %v1912_v2  ;;  %vm393_vm8 = vmand %vm391_vm3, %vm392_vm0  ;;  %v1013_v31 = vrot.slane %v1009_v36, %v2016_v7  ;;  %vm385_vm0 = vcmp.ge.s32.totalorder %v2002_v3, 16 }
  0x3d   : > { %901 = vrot.lane.b32.xlu0 %v900_v43, %s1932_s24  ;;  %vm960_vm9 = vmpackc.low %vm959_vm11, %vm959_vm11  ;;  %v941_v38 = vrot.slane %v937_v37, %v2016_v7  ;;  %v1249_v39 = vsel %vm393_vm8, 1, %v1912_v2  ;;  %vm386_vm11 = vcmp.lt.s32.totalorder %v2002_v3, 24  ;;  %s1953_s24 = smov 105  }
  0x3e   : > { %767 = vrot.lane.b32.xlu1 %v766_v42, %s1931_s23  ;;  %v961_v41 = vsel %vm960_vm9, 65537, %v1912_v2  ;;  %vm985_vm6 = vmpackc.low %vm370_vm5, %vm370_vm5  ;;  %vm1014_vm13 = vcmp.eq.s32.totalorder %v1013_v31, 1  ;;  %v1253_v42 = vrot.slane %v1249_v39, %v2016_v7 }
  0x3f   : > { %v965_v43 = vrot.slane %v961_v41, %v2016_v7  ;;  %v986_v44 = vsel %vm985_vm6, 65537, %v1912_v2  ;;  %vm1015_vm4 = vmpackc.low %vm1014_vm13, %vm1014_vm13  ;;  %vm329_vm13 = vcmask 654464  }
  0x40   : > { %vm1254_vm10 = vcmp.eq.s32.totalorder %v1253_v42, 1  ;;  %v990_v5 = vrot.slane %v986_v44, %v2016_v7  ;;  %v1016_v48 = vsel %vm1015_vm4, 65537, %v1912_v2  ;;  %vm387_vm8 = vmand %vm385_vm0, %vm386_vm11 }
  0x41   : > { %919 = vrot.lane.b32.xlu0 %v918_v51, %s1934_s26  ;;  %vm1255_vm9 = vmpackc.low %vm1254_vm10, %vm1254_vm10  ;;  %v1020_v49 = vrot.slane %v1016_v48, %v2016_v7 }
  0x42   : > { %1217 = vrot.lane.b32.xlu1 %v2105_v40, %s1928_s20  ;;  %v1256_v47 = vsel %vm1255_vm9, 65537, %v1912_v2  ;;  %vm606_vm6 = vmpackc.low %vm2044_vm2, %vm2044_vm2  ;;  %vm2787_vm2 = vcmask 523264  }
  0x43   : > { %v1260_v50 = vrot.slane %v1256_v47, %v2016_v7  ;;  %v607_v59 = vsel %vm606_vm6, 65537, %v1912_v2  ;;  %vm2788_vm0 = vmmov %vm2787_vm2 }
  0x44   : > { %v611_v3 = vrot.slane %v607_v59, %v2016_v7 }
  0x46   : > { %792 = vrot.lane.b32.xlu1 %v791_v45, %s1933_s25  ;;  %vm612_vm9 = vcmp.ne.s16.totalorder %v611_v3, 0 }
  0x4a   : > { %822 = vrot.lane.b32.xlu1 %v821_v55, %s1935_s27  ;;  %v1227_v55 = vsel %vm387_vm8, 1, %v1912_v2 }
  0x4b   : > { %v1231_v57 = vrot.slane %v1227_v55, %v2016_v7 }
  0x4d   : > { %vm1232_vm4 = vcmp.eq.s32.totalorder %v1231_v57, 1 }
  0x4e   : > { %850 = vrot.lane.b32.xlu1 %v849_v60, %s1936_s28  ;;  %vm1233_vm10 = vmpackc.low %vm1232_vm4, %vm1232_vm4 }
  0x52   : > { %1049 = vrot.lane.b32.xlu1 %v1048_v62, %s1916_s6  ;;  %s1938_s6 = smov 56   ;;  %v1234_v62 = vsel %vm1233_vm10, 65537, %v1912_v2 }
  0x56   : > { %1296 = vrot.lane.b32.xlu1 %v2276_v34, %s1937_s29 }
  0x5a   : > { %1319 = vrot.lane.b32.xlu1 %v2105_v40, %s1928_s20 }
  0x84   : > { %v2350_v63 = vpop.permute.xlu1 %472 }
  0x88   : > { %v2354_v1 = vpop.permute.xlu1 %408 }
  0x89   : > { %vm410_vm4 = vcmp.ne.s16.totalorder %v2354_v1, 0 }
  0x8b   : > { %v2352_v0 = vpop.permute.xlu0 %427 }
  0x8c   : > { %v2359_v4 = vpop.permute.xlu1 %588 }
  0x8d   : > { %vm590_vm3 = vcmp.ne.s16.totalorder %v2359_v4, 0 }
  0x90   : > { %v2363_v8 = vpop.permute.xlu1 %450 }
  0x91   : > { %vm452_vm10 = vcmp.ne.s16.totalorder %v2363_v8, 0 }
  0x93   : > { %v2361_v6 = vpop.permute.xlu0 %564 }
  0x94   : > { %v2367_v9 = vpop.permute.xlu1 %1077  ;;  %vm566_vm8 = vcmp.ne.s16.totalorder %v2361_v6, 0 }
  0x97   : > { %v2365_v40 = vpop.permute.xlu0 %629 }
  0x98   : > { %v2371_v11 = vpop.permute.xlu1 %1101 }
  0x99   : > { %vm1103_vm1 = vcmp.ne.s16.totalorder %v2371_v11, 0 }
  0x9a   : > { %v1105_v13 = vsel %vm1103_vm1, %v2120_v46, 0 }
  0x9b   : > { %v2369_v10 = vpop.permute.xlu0 %651  ;;  %1110 = vrot.lane.b32.xlu1 %v1105_v13, %s1938_s6 }
  0x9c   : > { %v2380_v14 = vpop.permute.xlu1 %523 }
  0x9f   : > { %v2374_v12 = vpop.permute.xlu0 %500 }
  0xa0   : > { %v2384_v16 = vpop.permute.xlu1 %702 }
  0xa3   : > { %v2382_v15 = vpop.permute.xlu0 %679 }
  0xa4   : > { %v2392_v20 = vpop.permute.xlu1 %1154 }
  0xa5   : > { %vm1156_vm15 = vcmp.ne.s16.totalorder %v2392_v20, 0 }
  0xa6   : > { %v1158_v21 = vsel %vm1156_vm15, %v2120_v46, 0 }
  0xa7   : > { %v2386_v17 = vpop.permute.xlu0 %1125 }
  0xa8   : > { %vm1127_vm12 = vcmp.ne.s16.totalorder %v2386_v17, 0  ;;  %v2399_v22 = vpop.permute.xlu1 %720 }
  0xa9   : > { %v1129_v19 = vsel %vm1127_vm12, %v2120_v46, 0 }
  0xaa   : > { %1134 = vrot.lane.b32.xlu1 %v1129_v19, %s1934_s26  ;;  %v1238_v19 = vrot.slane %v1234_v62, %v2016_v7 }
  0xab   : > { %v2462_v53 = vpop.permute.xlu0 %541 }
  0xac   : > { %v2402_v23 = vpop.permute.xlu1 %743 }
  0xae   : > { %1163 = vrot.lane.b32.xlu1 %v1158_v21, %s1939_s7 }
  0xaf   : > { %v2466_v54 = vpop.permute.xlu0 %901 }
  0xb0   : > { %v2404_v24 = vpop.permute.xlu1 %767 }
  0xb1   : > { %vm769_vm7 = vcmp.ne.s16.totalorder %v2404_v24, 0 }
  0xb2   : > { %774 = vrot.lane.b32.xlu1 %v1912_v2, %s1940_s8 }
  0xb3   : > { %v2469_v56 = vpop.permute.xlu0 %919 }
  0xb4   : > { %v1218_v60 = vpop.permute.xlu1 %1217 }
  0xb6   : > { %973 = vrot.lane.b32.xlu1 %v1912_v2, %s1938_s6 }
  0xb8   : > { %v2495_v27 = vpop.permute.xlu1 %792 }
  0xb9   : > { %vm794_vm11 = vcmp.ne.s16.totalorder %v2495_v27, 0 }
  0xba   : > { %799 = vrot.lane.b32.xlu1 %v1912_v2, %s1937_s29 }
  0xbe   : > { %998 = vrot.lane.b32.xlu1 %v1912_v2, %s1934_s26 }
  0xf0   : > { %v310_v28 = vpop.f32.mrb[0].mxu1 }
  0xf1   : > { %v1822_v30 = vpop.f32.mrb[1].mxu1 }
  0xf2   : > { %v313_v32 = vpop.f32.mrb[2].mxu1 }
  0xf3   : > { %v324_v33 = vpack.c.bf16 %v313_v32, %v310_v28  ;;  %v1823_v35 = vpop.f32.mrb[3].mxu1 }
  0xf5   : > { %326 = vrot.lane.b32.xlu0 %v324_v33, %s1937_s29 }
  0xf9   : > { %1194 = vrot.lane.b32.xlu0 %v2276_v34, %s1937_s29  ;;  %v866_v34 = vsel %vm2307_vm14, 1, %v1912_v2 }
  0xfa   : > { %v870_v45 = vrot.slane %v866_v34, %v2016_v7 }
  0xfc   : > { %vm871_vm5 = vcmp.eq.s32.totalorder %v870_v45, 1 }
  0xfd   : > { %942 = vrot.lane.b32.xlu0 %v941_v38, %s1941_s9  ;;  %vm872_vm14 = vmpackc.low %vm871_vm5, %vm871_vm5  ;;  %vm1239_vm5 = vcmp.ne.s16.totalorder %v1238_v19, 0 }
  0xfe   : > { %v873_v51 = vsel %vm872_vm14, 65537, %v1912_v2 }
  0xff   : > { %v877_v52 = vrot.slane %v873_v51, %v2016_v7 }
 0x101   : > { %966 = vrot.lane.b32.xlu0 %v965_v43, %s1920_s10  ;;  %s1942_s10 = smov 96  }
 0x105   : > { %991 = vrot.lane.b32.xlu0 %v990_v5, %s1929_s21 }
 0x109   : > { %1021 = vrot.lane.b32.xlu0 %v1020_v49, %s1926_s16  ;;  %s1947_s16 = smov 113  }
 0x10d   : > { %1261 = vrot.lane.b32.xlu0 %v1260_v50, %s1928_s20  ;;  %s1951_s20 = smov 111  }
 0x111   : > { %878 = vrot.lane.b32.xlu0 %v877_v52, %s1940_s8  ;;  %v1894_v52 = vld [vmem:[%s2743_s3 + $0x14] ss:$24 sps:$4 sm:$0xff]  }
 0x115   : > { %595 = vrot.lane.b32.xlu0 %v1912_v2, %s1921_s11 }
 0x119   : > { %1199 = vrot.lane.b32.xlu0 %v1912_v2, %s1933_s25 }
 0x11d   : > { %1222 = vrot.lane.b32.xlu0 %v1912_v2, %s1942_s10 }
 0x167   : > { %v327_v58 = vpop.permute.xlu0 %326 }
 0x168   : > { %330 = vst.msk [vmem:[#allocation2 + $0x8] sm:$0xff] %vm329_vm13, %v327_v58  ;;  %vm429_vm13 = vcmp.ne.s16.totalorder %v2352_v0, 0 }
 0x16b   : > { %v1195_v61 = vpop.permute.xlu0 %1194 }
 0x16f   : > { %v2480_v18 = vld [vmem:[#allocation2 + $0x8] sm:$0xff]  ;;  %v2482_v13 = vpop.permute.xlu0 %942 }
 0x170   : > { %v613_v21 = vsel %vm612_vm9, %v2480_v18, 0  ;;  %483 = vrot.lane.b32.xlu0 %v2480_v18, %s1933_s25  ;;  %v1240_v26 = vsel %vm1239_vm5, %v2480_v18, 0  ;;  %v567_v28 = vsel %vm566_vm8, %v2480_v18, 0  ;;  %v430_v29 = vsel %vm429_vm13, %v2480_v18, 0 }
 0x171   : > { %614 = vst.msk [vmem:[#allocation3 + $0x50] sm:$0xff] %vm2787_vm2, %v613_v21  ;;  %v411_v6 = vsel %vm410_vm4, %v2480_v18, 0  ;;  %v453_v30 = vsel %vm452_vm10, %v2480_v18, 0  ;;  %vm474_vm9 = vcmp.ne.s16.totalorder %v2350_v63, 0  ;;  %v592_v0 = vsel %vm590_vm3, %v2480_v18, 0 }
 0x172   : > { %1241 = vst.msk [vmem:[#allocation3 + $0x138] sm:$0xff] %vm2788_vm0, %v1240_v26  ;;  %413 = vrot.lane.b32.xlu1 %v411_v6, %s1945_s14  ;;  %v475_v32 = vsel %vm474_vm9, %v2480_v18, 0  ;;  %vm631_vm2 = vcmp.ne.s16.totalorder %v2365_v40, 0  ;;  %v1104_v8 = vsel %vm1103_vm1, %v2480_v18, 0  ;;  %vm653_vm3 = vcmp.ne.s16.totalorder %v2369_v10, 0  ;;  %s1954_s14 = smov 84  }
 0x173   : > { %v2489_v25 = vpop.permute.xlu0 %966  ;;  %v632_v1 = vsel %vm631_vm2, %v2480_v18, 0  ;;  %vm681_vm5 = vcmp.ne.s16.totalorder %v2382_v15, 0  ;;  %v654_v63 = vsel %vm653_vm3, %v2480_v18, 0  ;;  %vm1079_vm0 = vcmp.ne.s16.totalorder %v2367_v9, 0 }
 0x174   : > { %vm968_vm14 = vcmp.ne.s16.totalorder %v2489_v25, 0  ;;  %662 = vrot.lane.b32.xlu0 %v2480_v18, %s1933_s25  ;;  %v682_v4 = vsel %vm681_vm5, %v2480_v18, 0  ;;  %v1080_v40 = vsel %vm1079_vm0, %v2480_v18, 0  ;;  %v1128_v11 = vsel %vm1127_vm12, %v2480_v18, 0 }
 0x175   : > { %vm502_vm1 = vcmp.ne.s16.totalorder %v2374_v12, 0  ;;  %vm704_vm8 = vcmp.ne.s16.totalorder %v2384_v16, 0  ;;  %vm525_vm13 = vcmp.ne.s16.totalorder %v2380_v14, 0  ;;  %v1157_v17 = vsel %vm1156_vm15, %v2480_v18, 0  ;;  %v1888_v14 = vld [vmem:[%s2743_s3 + $0x4] ss:$24 sps:$4 sm:$0xff]  }
 0x176   : > { %597 = vrot.lane.b32.xlu1 %v592_v0, %s1921_s11  ;;  %s1948_s11 = smov 114   ;;  %v503_v10 = vsel %vm502_vm1, %v2480_v18, 0  ;;  %v705_v15 = vsel %vm704_vm8, %v2480_v18, 0  ;;  %v526_v9 = vsel %vm525_vm13, %v2480_v18, 0  ;;  %vm543_vm12 = vcmp.ne.s16.totalorder %v2462_v53, 0  ;;  %1470 = vmatprep.mubr.bf16.mxu0 %v1888_v14 }
 0x177   : > { %v2501_v7 = vpop.permute.xlu0 %991  ;;  %vm903_vm4 = vcmp.ne.s16.totalorder %v2466_v54, 0  ;;  %v544_v12 = vsel %vm543_vm12, %v2480_v18, 0  ;;  %vm722_vm15 = vcmp.ne.s16.totalorder %v2399_v22, 0  ;;  %vm921_vm10 = vcmp.ne.s16.totalorder %v2469_v56, 0  ;;  %v823_v22 = vpop.permute.xlu1 %822 }
 0x178   : > { %vm993_vm6 = vcmp.ne.s16.totalorder %v2501_v7, 0  ;;  %569 = vrot.lane.b32.xlu0 %v567_v28, %s1943_s12  ;;  %v904_v16 = vsel %vm903_vm4, %v2480_v18, 0  ;;  %v723_v20 = vsel %vm722_vm15, %v2480_v18, 0  ;;  %v922_v33 = vsel %vm921_vm10, %v2480_v18, 0 }
 0x179   : > { %vm745_vm9 = vcmp.ne.s16.totalorder %v2402_v23, 0  ;;  %v771_v37 = vsel %vm769_vm7, %v2480_v18, 0  ;;  %vm944_vm2 = vcmp.ne.s16.totalorder %v2482_v13, 0  ;;  %vm824_vm5 = vcmp.ne.s16.totalorder %v823_v22, 0 }
 0x17a   : > { %634 = vrot.lane.b32.xlu1 %v632_v1, %s1915_s30  ;;  %s1950_s30 = smov 104   ;;  %v746_v36 = vsel %vm745_vm9, %v2480_v18, 0  ;;  %v945_v31 = vsel %vm944_vm2, %v2480_v18, 0  ;;  %v970_v23 = vsel %vm968_vm14, %v2480_v18, 0  ;;  %v796_v38 = vsel %vm794_vm11, %v2480_v18, 0 }
 0x17b   : > { %v1022_v35 = vpop.permute.xlu0 %1021  ;;  %v851_v24 = vpop.permute.xlu1 %850  ;;  %v826_v44 = vsel %vm824_vm5, %v2480_v18, 0  ;;  %vm1431_vm8 = vcmask 654336   ;;  %vm2789_vm13 = vcmask 523264  }
 0x17c   : > { %432 = vrot.lane.b32.xlu0 %v430_v29, %s1944_s13  ;;  %vm1023_vm3 = vcmp.ne.s16.totalorder %v1022_v35, 0  ;;  %vm852_vm14 = vcmp.ne.s16.totalorder %v851_v24, 0  ;;  %1744 = vmatprep.mubr.msk.bf16.mxu1 %vm1431_vm8, %v1894_v52  ;;  %vm2790_vm12 = vmmov %vm2789_vm13  ;;  %v1373_v52 = vld [vmem:[#allocation3 + $0x120] sm:$0xff] }
 0x17d   : > { %v1025_v42 = vsel %vm1023_vm3, %v2480_v18, 0  ;;  %v853_v5 = vsel %vm852_vm14, %v2480_v18, 0  ;;  %vm2791_vm4 = vmmov %vm2790_vm12  ;;  %vm599_vm3 = vcmask 15360  }
 0x17e   : > { %656 = vrot.lane.b32.xlu1 %v654_v63, %s1948_s11  ;;  %vm2792_vm15 = vmmov %vm2791_vm4  ;;  %v1347_v63 = vld [vmem:[#allocation3 + $0x50] sm:$0xff] }
 0x17f   : > { %v1262_v39 = vpop.permute.xlu0 %1261  ;;  %v1050_v41 = vpop.permute.xlu1 %1049  ;;  %vm2793_vm10 = vmmov %vm2791_vm4 }
 0x180   : > { %455 = vrot.lane.b32.xlu0 %v453_v30, %s1946_s15  ;;  %s1955_s15 = smov 94   ;;  %vm1263_vm7 = vcmp.ne.s16.totalorder %v1262_v39, 0  ;;  %vm2794_vm9 = vmmov %vm2791_vm4 }
 0x181   : > { %v1264_v43 = vsel %vm1263_vm7, %v2480_v18, 0  ;;  %vm2795_vm2 = vmmov %vm2791_vm4 }
 0x182   : > { %1082 = vrot.lane.b32.xlu1 %v1080_v40, %s1950_s30  ;;  %vm2796_vm5 = vmmov %vm2795_vm2 }
 0x183   : > { %v1297_v34 = vpop.permute.xlu1 %1296  ;;  %v879_v45 = vpop.permute.xlu0 %878  ;;  %vm2797_vm7 = vmmov %vm2795_vm2 }
 0x184   : > { %477 = vrot.lane.b32.xlu0 %v475_v32, %s1947_s16  ;;  %vm880_vm11 = vcmp.ne.s16.totalorder %v879_v45, 0  ;;  %vm1298_vm1 = vcmp.ne.s16.totalorder %v1297_v34, 0  ;;  %vm2798_vm14 = vmmov %vm2795_vm2 }
 0x185   : > { %v881_v49 = vsel %vm880_vm11, %v2480_v18, 0  ;;  %v1299_v51 = vsel %vm1298_vm1, %v2120_v46, 0  ;;  %vm977_vm11 = vcmask 457728  }
 0x186   : > { %505 = vrot.lane.b32.xlu1 %v503_v10, %s1951_s20 }
 0x187   : > { %v1320_v48 = vpop.permute.xlu1 %1319  ;;  %v596_v54 = vpop.permute.xlu0 %595 }
 0x188   : > { %1108 = vrot.lane.b32.xlu0 %v1104_v8, %s1938_s6  ;;  %vm1321_vm0 = vcmp.ne.s16.totalorder %v1320_v48, 0 }
 0x189   : > { %v1322_v50 = vsel %vm1321_vm0, %v2120_v46, 0  ;;  %vm2800_vm0 = vmmov %vm2795_vm2 }
 0x18a   : > { %528 = vrot.lane.b32.xlu1 %v526_v9, %s1953_s24  ;;  %vm2801_vm1 = vmmov %vm2800_vm0 }
 0x18b   : > { %v1111_v53 = vpop.permute.xlu1 %1110  ;;  %v1200_v56 = vpop.permute.xlu0 %1199 }
 0x18c   : > { %684 = vrot.lane.b32.xlu0 %v682_v4, %s1949_s17  ;;  %1202 = vst.msk [vmem:[#allocation3 + $0x128] sm:$0xff] %vm2789_vm13, %v1200_v56  ;;  %vm2802_vm13 = vmmov %vm2800_vm0 }
 0x18e   : > { %546 = vrot.lane.b32.xlu1 %v544_v12, %s1950_s30 }
 0x18f   : > { %v1135_v55 = vpop.permute.xlu1 %1134  ;;  %v1223_v58 = vpop.permute.xlu0 %1222 }
 0x190   : > { %1132 = vrot.lane.b32.xlu0 %v1128_v11, %s1934_s26  ;;  %1225 = vst.msk [vmem:[#allocation3 + $0x130] sm:$0xff] %vm2790_vm12, %v1223_v58  ;;  %vm1002_vm12 = vcmask 392192  }
 0x192   : > { %725 = vrot.lane.b32.xlu1 %v723_v20, %s1942_s10 }
 0x193   : > { %v2618_v57 = vpop.permute.xlu1 %1163 }
 0x194   : > { %707 = vrot.lane.b32.xlu0 %v705_v15, %s1952_s22  ;;  %s1825_s22 = smul.u32 12, %s2835_s19 }
 0x196   : > { %748 = vrot.lane.b32.xlu1 %v746_v36, %s1955_s15  ;;  %v2648_v36 = vld [vmem:[#allocation2] sm:$0xff]  ;;  %s2720_s12 = scalar_lea.vmem %s2744_s4, %s1825_s22 }
 0x197   : > { %v2621_v46 = vpop.permute.xlu1 %774 }
 0x198   : > { %1161 = vrot.lane.b32.xlu0 %v1157_v17, %s1939_s7 }
 0x19b   : > { %v2624_v3 = vpop.permute.xlu1 %973 }
 0x19c   : > { %906 = vrot.lane.b32.xlu0 %v904_v16, %s1954_s14  ;;  %s1826_s14 = smul.u32 24, %s2835_s19 }
 0x19f   : > { %v2627_v61 = vpop.permute.xlu1 %799 }
 0x1a0   : > { %924 = vrot.lane.b32.xlu0 %v922_v33, %s1929_s21  ;;  %s1956_s21 = smov 76  }
 0x1a1   : > { %947 = vrot.lane.b32.xlu1 %v945_v31, %s1956_s21 }
 0x1a4   : > { %776 = vrot.lane.b32.xlu0 %v771_v37, %s1940_s8 }
 0x1a5   : > { %829 = vrot.lane.b32.xlu1 %v1912_v2, %s1936_s28 }
 0x1a8   : > { %1028 = vrot.lane.b32.xlu0 %v1912_v2, %s1939_s7  ;;  %v995_v2 = vsel %vm993_vm6, %v2480_v18, 0  ;;  %vm1051_vm6 = vcmp.ne.s16.totalorder %v1050_v41, 0 }
 0x1a9   : > { %1244 = vrot.lane.b32.xlu1 %v2480_v18, %s1933_s25  ;;  %v1052_v47 = vsel %vm1051_vm6, %v2480_v18, 0  ;;  %vm2799_vm6 = vmmov %vm2795_vm2 }
 0x1ac   : > { %975 = vrot.lane.b32.xlu0 %v970_v23, %s1938_s6 }
 0x1ad   : > { %1030 = vrot.lane.b32.xlu1 %v1025_v42, %s1939_s7 }
 0x1b0   : > { %801 = vrot.lane.b32.xlu0 %v796_v38, %s1937_s29 }
 0x1b1   : > { %1266 = vrot.lane.b32.xlu1 %v1264_v43, %s1942_s10 }
 0x1b4   : > { %1000 = vrot.lane.b32.xlu0 %v995_v2, %s1934_s26  ;;  %s237_s26 = scalar_lea.vmem %s2745_s5, %s1826_s14 }
 0x1b5   : > { %861 = vrot.lane.b32.xlu1 %v2480_v18, %s1933_s25 }
 0x1b8   : > { %831 = vrot.lane.b32.xlu0 %v826_v44, %s1936_s28 }
 0x1b9   : > { %883 = vrot.lane.b32.xlu1 %v881_v49, %s1931_s23 }
 0x1bc   : > { %855 = vrot.lane.b32.xlu0 %v853_v5, %s1935_s27  ;;  %v1334_v5 = vld [vmem:[%s2743_s3 + $0x30] sm:$0x33] }
 0x1bd   : > { %1324 = vrot.lane.b32.xlu1 %v1322_v50, %s1942_s10 }
 0x1c0   : > { %1054 = vrot.lane.b32.xlu0 %v1052_v47, %s1944_s13 }
 0x1c4   : > { %1060 = vrot.lane.b32.xlu0 %v2480_v18, %s1933_s25  ;;  %v2630_v18 = vpop.permute.xlu1 %998 }
 0x1c8   : > { %1301 = vrot.lane.b32.xlu0 %v1299_v51, %s1933_s25  ;;  %v1886_v51 = vld [vmem:[%s2743_s3] ss:$24 sps:$4 sm:$0xff]  }
 0x1e2   : > { %v484_v59 = vpop.permute.xlu0 %483 }
 0x1e3   : > { %486 = vst.msk [vmem:[#allocation3 + $0x20] sm:$0xff] %vm2791_vm4, %v484_v59  ;;  %vm2803_vm4 = vmmov %vm2800_vm0 }
 0x1e4   : > { %v414_v19 = vpop.permute.xlu1 %413 }
 0x1e5   : > { %417 = vst.msk [vmem:[#allocation3] sm:$0xff] %vm2795_vm2, %v414_v19  ;;  %vm2807_vm2 = vmmov %vm2800_vm0  ;;  %v1893_v19 = vld [vmem:[%s2743_s3 + $0xc] ss:$24 sps:$4 sm:$0xff]  }
 0x1e6   : > { %v663_v60 = vpop.permute.xlu0 %662 }
 0x1e7   : > { %665 = vst.msk [vmem:[#allocation3 + $0x68] sm:$0xff] %vm2792_vm15, %v663_v60  ;;  %vm2804_vm15 = vmmov %vm2800_vm0 }
 0x1e8   : > { %v598_v26 = vpop.permute.xlu1 %597 }
 0x1e9   : > { %v600_v27 = vsel %vm599_vm3, %v596_v54, %v598_v26  ;;  %vm2808_vm3 = vcmask 326656   ;;  %v1375_v26 = vld [vmem:[#allocation3 + $0x130] sm:$0xff] }
 0x1ea   : > { %v570_v62 = vpop.permute.xlu0 %569  ;;  %602 = vst.msk [vmem:[#allocation3 + $0x48] sm:$0xff] %vm2797_vm7, %v600_v27  ;;  %v1341_v35 = vld [vmem:[#allocation3 + $0x20] sm:$0xff]  ;;  %vm2810_vm7 = vmmov %vm2800_vm0 }
 0x1eb   : > { %572 = vst.msk [vmem:[#allocation3 + $0x40] sm:$0xff] %vm2793_vm10, %v570_v62  ;;  %vm2805_vm10 = vmmov %vm2800_vm0 }
 0x1ec   : > { %v635_v28 = vpop.permute.xlu1 %634  ;;  %v1337_v29 = vld [vmem:[#allocation3] sm:$0xff] }
 0x1ed   : > { %637 = vst.msk [vmem:[#allocation3 + $0x58] sm:$0xff] %vm2799_vm6, %v635_v28  ;;  %vm2812_vm6 = vmmov %vm2800_vm0 }
 0x1ee   : > { %v433_v13 = vpop.permute.xlu0 %432  ;;  %v1350_v22 = vld [vmem:[#allocation3 + $0x68] sm:$0xff] }
 0x1ef   : > { %435 = vst.msk [vmem:[#allocation3 + $0x8] sm:$0xff] %vm2794_vm9, %v433_v13  ;;  %vm2806_vm9 = vmmov %vm2800_vm0  ;;  %v1738_v13 = vcombine.low %v1334_v5, %v1334_v5 }
 0x1f0   : > { %v657_v0 = vpop.permute.xlu1 %656 }
 0x1f1   : > { %659 = vst.msk [vmem:[#allocation3 + $0x60] sm:$0xff] %vm2801_vm1, %v657_v0  ;;  %v1346_v32 = vld [vmem:[#allocation3 + $0x48] sm:$0xff]  ;;  %vm778_vm1 = vcmask 162816  }
 0x1f2   : > { %v456_v21 = vpop.permute.xlu0 %455  ;;  %v1345_v25 = vld [vmem:[#allocation3 + $0x40] sm:$0xff] }
 0x1f3   : > { %458 = vst.msk [vmem:[#allocation3 + $0x10] sm:$0xff] %vm2796_vm5, %v456_v21  ;;  %1758 = vmatprep.subr.bf16.mxu0 %v1345_v25  ;;  %vm2809_vm5 = vmmov %vm2800_vm0 }
 0x1f4   : > { %1759 = vmatpush3.bf16.msra.mxu0 %v1337_v29  ;;  %v1083_v4 = vpop.permute.xlu1 %1082  ;;  %v1348_v15 = vld [vmem:[#allocation3 + $0x58] sm:$0xff] }
 0x1f5   : > { %1760 = vmatprep.subr.bf16.mxu0 %v1346_v32  ;;  %1085 = vst.msk [vmem:[#allocation3 + $0x100] sm:$0xff] %vm2803_vm4, %v1083_v4  ;;  %vm2814_vm4 = vmmov %vm2800_vm0  ;;  %v1376_v29 = vld [vmem:[#allocation3 + $0x138] sm:$0xff] }
 0x1f6   : > { %v478_v7 = vpop.permute.xlu0 %477  ;;  %v1338_v8 = vld [vmem:[#allocation3 + $0x8] sm:$0xff] }
 0x1f7   : > { %480 = vst.msk [vmem:[#allocation3 + $0x18] sm:$0xff] %vm2798_vm14, %v478_v7  ;;  %vm2811_vm14 = vmmov %vm2800_vm0 }
 0x1f8   : > { %1761 = vmatpush3.bf16.msra.mxu0 %v1338_v8  ;;  %v506_v9 = vpop.permute.xlu1 %505  ;;  %v1349_v14 = vld [vmem:[#allocation3 + $0x60] sm:$0xff] }
 0x1f9   : > { %1762 = vmatprep.subr.bf16.mxu0 %v1347_v63  ;;  %508 = vst.msk [vmem:[#allocation3 + $0x28] sm:$0xff] %vm2805_vm10, %v506_v9  ;;  %vm2816_vm10 = vmmov %vm2800_vm0 }
 0x1fa   : > { %v1109_v6 = vpop.permute.xlu0 %1108  ;;  %v1339_v11 = vld [vmem:[#allocation3 + $0x10] sm:$0xff] }
 0x1fb   : > { %v1112_v30 = vsel %vm977_vm11, %v1109_v6, %v1111_v53  ;;  %v1739_v53 = vcombine.high %v1334_v5, %v1334_v5 }
 0x1fc   : > { %1114 = vst.msk [vmem:[#allocation3 + $0x108] sm:$0xff] %vm2800_vm0, %v1112_v30  ;;  %1763 = vmatpush3.bf16.msra.mxu0 %v1339_v11  ;;  %v529_v16 = vpop.permute.xlu1 %528  ;;  %v1369_v20 = vld [vmem:[#allocation3 + $0x100] sm:$0xff] }
 0x1fd   : > { %1764 = vmatprep.subr.bf16.mxu0 %v1348_v15  ;;  %531 = vst.msk [vmem:[#allocation3 + $0x30] sm:$0xff] %vm2807_vm2, %v529_v16  ;;  %1535 = vmatpush1.bf16.msra.mxu1 %v1369_v20  ;;  %vm2819_vm2 = vmmov %vm2800_vm0 }
 0x1fe   : > { %v685_v1 = vpop.permute.xlu0 %684  ;;  %v1340_v12 = vld [vmem:[#allocation3 + $0x18] sm:$0xff]  ;;  %1536 = vmatprep.subr.bf16.mxu1 %v2648_v36 }
 0x1ff   : > { %687 = vst.msk [vmem:[#allocation3 + $0x70] sm:$0xff] %vm2802_vm13, %v685_v1  ;;  %vm2813_vm13 = vmmov %vm2800_vm0 }
 0x200   : > { %1765 = vmatpush3.bf16.msra.mxu0 %v1340_v12  ;;  %v547_v31 = vpop.permute.xlu1 %546  ;;  %v1342_v38 = vld [vmem:[#allocation3 + $0x28] sm:$0xff]  ;;  %v1379_v12 = vld [vmem:[#allocation3 + $0x150] sm:$0xff] }
 0x201   : > { %1766 = vmatprep.subr.bf16.mxu0 %v1349_v14  ;;  %549 = vst.msk [vmem:[#allocation3 + $0x38] sm:$0xff] %vm2810_vm7, %v547_v31  ;;  %vm2821_vm7 = vmmov %vm2800_vm0  ;;  %v1335_v31 = vld [vmem:[%s2743_s3 + $0x38] sm:$0x33] }
 0x202   : > { %v1133_v40 = vpop.permute.xlu0 %1132 }
 0x203   : > { %v1136_v10 = vsel %vm1002_vm12, %v1133_v40, %v1135_v55  ;;  %v1370_v23 = vld [vmem:[#allocation3 + $0x108] sm:$0xff] }
 0x204   : > { %1138 = vst.msk [vmem:[#allocation3 + $0x110] sm:$0xff] %vm2804_vm15, %v1136_v10  ;;  %1767 = vmatpush3.bf16.msra.mxu0 %v1341_v35  ;;  %1537 = vmatpush1.bf16.msra.mxu1 %v1370_v23  ;;  %v726_v41 = vpop.permute.xlu1 %725  ;;  %v1343_v43 = vld [vmem:[#allocation3 + $0x30] sm:$0xff]  ;;  %vm2815_vm15 = vmmov %vm2800_vm0 }
 0x205   : > { %1768 = vmatprep.subr.bf16.mxu0 %v1350_v22  ;;  %1538 = vmatprep.subr.bf16.mxu1 %v2648_v36  ;;  %728 = vst.msk [vmem:[#allocation3 + $0x80] sm:$0xff] %vm2812_vm6, %v726_v41  ;;  %vm2822_vm6 = vmmov %vm2800_vm0 }
 0x206   : > { %v708_v17 = vpop.permute.xlu0 %707  ;;  %v1351_v39 = vld [vmem:[#allocation3 + $0x70] sm:$0xff] }
 0x207   : > { %710 = vst.msk [vmem:[#allocation3 + $0x78] sm:$0xff] %vm2806_vm9, %v708_v17  ;;  %vm2817_vm9 = vmmov %vm2800_vm0 }
 0x208   : > { %1769 = vmatpush3.bf16.msra.mxu0 %v1342_v38  ;;  %v749_v45 = vpop.permute.xlu1 %748  ;;  %v1344_v47 = vld [vmem:[#allocation3 + $0x38] sm:$0xff]  ;;  %v1891_v38 = vld [vmem:[%s2743_s3 + $0x8] ss:$24 sps:$4 sm:$0xff]  }
 0x209   : > { %1770 = vmatprep.subr.bf16.mxu0 %v1351_v39  ;;  %751 = vst.msk [vmem:[#allocation3 + $0x88] sm:$0xff] %vm2813_vm13, %v749_v45  ;;  %vm2825_vm13 = vmmov %vm2800_vm0  ;;  %v1741_v39 = vcombine.high %v1335_v31, %v1335_v31 }
 0x20a   : > { %v1162_v33 = vpop.permute.xlu0 %1161 }
 0x20b   : > { %v1165_v37 = vsel %vm2808_vm3, %v1162_v33, %v2618_v57  ;;  %v1371_v42 = vld [vmem:[#allocation3 + $0x110] sm:$0xff] }
 0x20c   : > { %1167 = vst.msk [vmem:[#allocation3 + $0x118] sm:$0xff] %vm2809_vm5, %v1165_v37  ;;  %1539 = vmatpush1.bf16.msra.mxu1 %v1371_v42  ;;  %1771 = vmatpush3.bf16.msra.mxu0 %v1343_v43  ;;  %v1353_v57 = vld [vmem:[#allocation3 + $0x80] sm:$0xff]  ;;  %vm2820_vm5 = vmmov %vm2800_vm0  ;;  %v1897_v43 = vld [vmem:[%s2743_s3 + $0x10] ss:$24 sps:$4 sm:$0xff]  }
 0x20d   : > { %1540 = vmatprep.subr.bf16.mxu1 %v2648_v36 }
 0x20e   : > { %v907_v24 = vpop.permute.xlu0 %906  ;;  %v1352_v44 = vld [vmem:[#allocation3 + $0x78] sm:$0xff] }
 0x20f   : > { %909 = vst.msk [vmem:[#allocation3 + $0xc0] sm:$0xff] %vm2811_vm14, %v907_v24  ;;  %1772 = vmatprep.subr.bf16.mxu0 %v1352_v44  ;;  %vm833_vm14 = vcmask 97280  }
 0x210   : > { %1773 = vmatpush3.bf16.msra.mxu0 %v1344_v47  ;;  %v1354_v60 = vld [vmem:[#allocation3 + $0x88] sm:$0xff] }
 0x212   : > { %v925_v2 = vpop.permute.xlu0 %924 }
 0x213   : > { %927 = vst.msk [vmem:[#allocation3 + $0xc8] sm:$0xff] %vm2800_vm0, %v925_v2  ;;  %v1372_v34 = vld [vmem:[#allocation3 + $0x118] sm:$0xff]  ;;  %v948_v54 = vpop.permute.xlu1 %947  ;;  %1471 = vmatmul.mubr.bf16.vlgmr.msra.gmra.mrb[0].mxu0 %v1886_v51  ;;  %v1336_v2 = vld [vmem:[%s2743_s3 + $0x40] sm:$0x33] }
 0x214   : > { %1541 = vmatpush1.bf16.msra.mxu1 %v1372_v34  ;;  %950 = vst.msk [vmem:[#allocation3 + $0xd0] sm:$0xff] %vm2815_vm15, %v948_v54  ;;  %1478 = vmatprep.mubr.bf16.mxu0 %v1739_v53  ;;  %vm2827_vm15 = vmmov %vm2800_vm0  ;;  %v1740_v34 = vcombine.low %v1335_v31, %v1335_v31  ;;  %v1743_v44 = vcombine.high %v1336_v2, %v1336_v2 }
 0x215   : > { %1542 = vmatprep.subr.bf16.mxu1 %v2648_v36  ;;  %v1742_v45 = vcombine.low %v1336_v2, %v1336_v2 }
 0x216   : > { %v777_v48 = vpop.permute.xlu0 %776  ;;  %v1361_v49 = vld [vmem:[#allocation3 + $0xc0] sm:$0xff] }
 0x217   : > { %v779_v50 = vsel %vm778_vm1, %v2621_v46, %v777_v48  ;;  %1786 = vmatprep.subr.bf16.mxu0 %v1361_v49  ;;  %v830_v58 = vpop.permute.xlu1 %829  ;;  %v1374_v46 = vld [vmem:[#allocation3 + $0x128] sm:$0xff]  ;;  %vm2824_vm1 = vmmov %vm2800_vm0 }
 0x218   : > { %781 = vst.msk [vmem:[#allocation3 + $0x90] sm:$0xff] %vm2814_vm4, %v779_v50  ;;  %1543 = vmatpush1.bf16.msra.mxu1 %v1373_v52  ;;  %1787 = vmatpush3.bf16.msra.mxu0 %v1353_v57  ;;  %vm2826_vm4 = vmmov %vm2800_vm0 }
 0x219   : > { %1544 = vmatprep.subr.bf16.mxu1 %v2648_v36 }
 0x21a   : > { %v1029_v55 = vpop.permute.xlu0 %1028  ;;  %v1362_v56 = vld [vmem:[#allocation3 + $0xc8] sm:$0xff] }
 0x21b   : > { %1788 = vmatprep.subr.bf16.mxu0 %v1362_v56  ;;  %v1245_v21 = vpop.permute.xlu1 %1244  ;;  %v1363_v25 = vld [vmem:[#allocation3 + $0xd0] sm:$0xff]  ;;  %1479 = vmatmul.mubr.bf16.gmra.mrb[4].mxu0 %v1738_v13 }
 0x21c   : > { %1545 = vmatpush1.bf16.msra.mxu1 %v1374_v46  ;;  %1789 = vmatpush3.bf16.msra.mxu0 %v1354_v60  ;;  %1247 = vst.msk [vmem:[#allocation3 + $0x140] sm:$0xff] %vm2817_vm9, %v1245_v21  ;;  %vm2829_vm9 = vmmov %vm2800_vm0 }
 0x21d   : > { %1546 = vmatprep.subr.bf16.mxu1 %v2648_v36  ;;  %1790 = vmatprep.subr.bf16.mxu0 %v1363_v25 }
 0x21e   : > { %v976_v59 = vpop.permute.xlu0 %975  ;;  %1518 = vmatprep.mubr.bf16.mxu0 %v1893_v19 }
 0x21f   : > { %v978_v62 = vsel %vm977_vm11, %v2624_v3, %v976_v59  ;;  %v1355_v27 = vld [vmem:[#allocation3 + $0x90] sm:$0xff]  ;;  %vm2818_vm11 = vcmask 130048   ;;  %v1031_v28 = vpop.permute.xlu1 %1030 }
 0x220   : > { %980 = vst.msk [vmem:[#allocation3 + $0xd8] sm:$0xff] %vm2816_vm10, %v978_v62  ;;  %1547 = vmatpush1.bf16.msra.mxu1 %v1375_v26  ;;  %1791 = vmatpush3.bf16.msra.mxu0 %v1355_v27  ;;  %v1033_v6 = vsel %vm2808_vm3, %v1029_v55, %v1031_v28  ;;  %vm2828_vm10 = vmmov %vm2800_vm0 }
 0x221   : > { %1548 = vmatprep.subr.bf16.mxu1 %v2648_v36  ;;  %1035 = vst.msk [vmem:[#allocation3 + $0xe8] sm:$0xff] %vm2820_vm5, %v1033_v6  ;;  %vm2832_vm3 = vmmov %vm2800_vm0 }
 0x222   : > { %v802_v7 = vpop.permute.xlu0 %801  ;;  %vm2833_vm5 = vmmov %vm2800_vm0 }
 0x223   : > { %v804_v3 = vsel %vm2818_vm11, %v2627_v61, %v802_v7  ;;  %v1267_v32 = vpop.permute.xlu1 %1266  ;;  %v1377_v1 = vld [vmem:[#allocation3 + $0x140] sm:$0xff]  ;;  %vm2830_vm11 = vmmov %vm2800_vm0 }
 0x224   : > { %806 = vst.msk [vmem:[#allocation3 + $0x98] sm:$0xff] %vm2819_vm2, %v804_v3  ;;  %1549 = vmatpush1.bf16.msra.mxu1 %v1376_v29  ;;  %vm2831_vm2 = vmmov %vm2800_vm0 }
 0x225   : > { %1550 = vmatprep.subr.bf16.mxu1 %v2648_v36  ;;  %1269 = vst.msk [vmem:[#allocation3 + $0x148] sm:$0xff] %vm2822_vm6, %v1267_v32  ;;  %vm1626_vm6 = vcmask 15368  }
 0x226   : > { %v1001_v30 = vpop.permute.xlu0 %1000 }
 0x227   : > { %v1003_v0 = vsel %vm1002_vm12, %v2630_v18, %v1001_v30  ;;  %v1364_v61 = vld [vmem:[#allocation3 + $0xd8] sm:$0xff]  ;;  %v862_v18 = vpop.permute.xlu1 %861  ;;  %vm2823_vm12 = vmmov %vm2800_vm0 }
 0x228   : > { %1005 = vst.msk [vmem:[#allocation3 + $0xe0] sm:$0xff] %vm2821_vm7, %v1003_v0  ;;  %1792 = vmatprep.subr.bf16.mxu0 %v1364_v61  ;;  %1551 = vmatpush1.bf16.msra.mxu1 %v1377_v1  ;;  %v1366_v14 = vld [vmem:[#allocation3 + $0xe8] sm:$0xff]  ;;  %vm1598_vm7 = vcmask 517120  }
 0x229   : > { %1552 = vmatprep.subr.bf16.mxu1 %v2648_v36  ;;  %864 = vst.msk [vmem:[#allocation3 + $0xb0] sm:$0xff] %vm2823_vm12, %v862_v18  ;;  %vm1629_vm12 = vcmask 11272  }
 0x22a   : > { %v832_v8 = vpop.permute.xlu0 %831 }
 0x22b   : > { %v834_v63 = vsel %vm833_vm14, %v830_v58, %v832_v8  ;;  %v1356_v4 = vld [vmem:[#allocation3 + $0x98] sm:$0xff]  ;;  %v884_v10 = vpop.permute.xlu1 %883  ;;  %vm1609_vm14 = vcmask 7168  }
 0x22c   : > { %836 = vst.msk [vmem:[#allocation3 + $0xa0] sm:$0xff] %vm2800_vm0, %v834_v63  ;;  %1793 = vmatpush3.bf16.msra.mxu0 %v1356_v4  ;;  %v1378_v15 = vld [vmem:[#allocation3 + $0x148] sm:$0xff]  ;;  %vm1612_vm0 = vcmask 3072  }
 0x22d   : > { %886 = vst.msk [vmem:[#allocation3 + $0xb8] sm:$0xff] %vm2825_vm13, %v884_v10  ;;  %1553 = vmatpush1.bf16.msra.mxu1 %v1378_v15 }
 0x22e   : > { %v856_v40 = vpop.permute.xlu0 %855  ;;  %1554 = vmatprep.subr.bf16.mxu1 %v2648_v36 }
 0x22f   : > { %858 = vst.msk [vmem:[#allocation3 + $0xa8] sm:$0xff] %vm2824_vm1, %v856_v40  ;;  %v1365_v11 = vld [vmem:[#allocation3 + $0xe0] sm:$0xff]  ;;  %v1325_v16 = vpop.permute.xlu1 %1324 }
 0x230   : > { %1794 = vmatprep.subr.bf16.mxu0 %v1365_v11  ;;  %1327 = vst.msk [vmem:[#allocation3 + $0x160] sm:$0xff] %vm2827_vm15, %v1325_v16  ;;  %v1359_v22 = vld [vmem:[#allocation3 + $0xb0] sm:$0xff] }
 0x231   : > { %1555 = vmatpush1.bf16.msra.mxu1 %v1379_v12 }
 0x232   : > { %v1055_v9 = vpop.permute.xlu0 %1054  ;;  %1556 = vmatprep.subr.bf16.mxu1 %v2648_v36 }
 0x233   : > { %1057 = vst.msk [vmem:[#allocation3 + $0xf0] sm:$0xff] %vm2826_vm4, %v1055_v9  ;;  %v1357_v17 = vld [vmem:[#allocation3 + $0xa0] sm:$0xff] }
 0x234   : > { %1795 = vmatpush3.bf16.msra.mxu0 %v1357_v17  ;;  %v1360_v24 = vld [vmem:[#allocation3 + $0xb8] sm:$0xff] }
 0x235   : > { %1796 = vmatprep.subr.bf16.mxu0 %v1366_v14 }
 0x236   : > { %v1061_v20 = vpop.permute.xlu0 %1060  ;;  %v1358_v33 = vld [vmem:[#allocation3 + $0xa8] sm:$0xff] }
 0x237   : > { %1063 = vst.msk [vmem:[#allocation3 + $0xf8] sm:$0xff] %vm2828_vm10, %v1061_v20  ;;  %v1381_v42 = vld [vmem:[#allocation3 + $0x160] sm:$0xff] }
 0x238   : > { %1797 = vmatpush3.bf16.msra.mxu0 %v1358_v33 }
 0x23a   : > { %v1302_v35 = vpop.permute.xlu0 %1301  ;;  %v1367_v37 = vld [vmem:[#allocation3 + $0xf0] sm:$0xff] }
 0x23b   : > { %1304 = vst.msk [vmem:[#allocation3 + $0x158] sm:$0xff] %vm2829_vm9, %v1302_v35  ;;  %1798 = vmatprep.subr.bf16.mxu0 %v1367_v37 }
 0x23c   : > { %1799 = vmatpush3.bf16.msra.mxu0 %v1359_v22 }
 0x23e   : > { %v1368_v23 = vld [vmem:[#allocation3 + $0xf8] sm:$0xff] }
 0x23f   : > { %1800 = vmatprep.subr.bf16.mxu0 %v1368_v23 }
 0x240   : > { %1801 = vmatpush3.bf16.msra.mxu0 %v1360_v24 }
 0x242   : > { %v1380_v41 = vld [vmem:[#allocation3 + $0x158] sm:$0xff] }
 0x243   : > { %1519 = vmatmul.mubr.bf16.vlgmr.msra.gmra.mrb[8].mxu0 %v1891_v38  ;;  %1557 = vmatpush1.bf16.msra.mxu1 %v1380_v41 }
 0x244   : > { %1558 = vmatprep.subr.bf16.mxu1 %v2648_v36  ;;  %1526 = vmatprep.mubr.bf16.mxu0 %v1741_v39 }
 0x247   : > { %1559 = vmatpush1.bf16.msra.mxu1 %v1381_v42 }
 0x24a   : > { %1567 = vmatmul.mubr.bf16.vlgmr.msra.gmra.mrb[4].mxu1 %v1897_v43 }
 0x24b   : > { %1527 = vmatmul.mubr.bf16.gmra.mrb[12].mxu0 %v1740_v34  ;;  %1745 = vmatprep.mubr.msk.bf16.mxu1 %vm1431_vm8, %v1743_v44  ;;  %vm1595_vm8 = vcmask 519168  }
 0x252   : > { %1575 = vmatmul.mubr.bf16.gmra.mrb[8].mxu1 %v1742_v45 }
 0x2e6   : > { %v1774_v36 = vpop.f32.mrb[0].mxu0 }
 0x2e7   : > { %v1775_v5 = vpop.f32.mrb[1].mxu0 }
 0x2e8   : > { %v1776_v48 = vadd.f32 %v1775_v5, %v1774_v36  ;;  %v1777_v49 = vpop.f32.mrb[2].mxu0 }
 0x2e9   : > { %v1778_v47 = vpop.f32.mrb[3].mxu0 }
 0x2ea   : > { %v1779_v50 = vadd.f32 %v1778_v47, %v1777_v49 }
 0x2ee   : > { %v1780_v51 = vpop.f32.mrb[4].mxu0 }
 0x2ef   : > { %v1781_v52 = vpop.f32.mrb[5].mxu0 }
 0x2f0   : > { %v1782_v53 = vadd.f32 %v1781_v52, %v1780_v51  ;;  %v1783_v54 = vpop.f32.mrb[6].mxu0 }
 0x2f1   : > { %v1784_v55 = vpop.f32.mrb[7].mxu0 }
 0x316   : > { %v1802_v56 = vpop.f32.mrb[8].mxu0 }
 0x317   : > { %v1803_v57 = vpop.f32.mrb[9].mxu0 }
 0x318   : > { %v1804_v58 = vadd.f32 %v1803_v57, %v1802_v56  ;;  %v1805_v46 = vpop.f32.mrb[10].mxu0 }
 0x319   : > { %v1806_v59 = vpop.f32.mrb[11].mxu0 }
 0x31a   : > { %v1807_v60 = vadd.f32 %v1806_v59, %v1805_v46  ;;  %v1521_v62 = vadd.f32 %v1804_v58, %v1776_v48 }
 0x31c   : > { %v1524_v13 = vadd.f32 %v1807_v60, %v1779_v50 }
 0x31d   : > { %v1568_v19 = vpop.f32.mrb[4].mxu1 }
 0x31e   : > { %v1569_v21 = vadd.f32 %v1568_v19, %v1521_v62  ;;  %v1808_v25 = vpop.f32.mrb[12].mxu0  ;;  %v1570_v26 = vpop.f32.mrb[5].mxu1 }
 0x31f   : > { %v1809_v27 = vpop.f32.mrb[13].mxu0  ;;  %v1571_v7 = vpop.f32.mrb[6].mxu1 }
 0x320   : > { %v1751_v3 = vpack.c.bf16 %v1569_v21, %v1569_v21  ;;  %v1810_v28 = vadd.f32 %v1809_v27, %v1808_v25  ;;  %v1572_v29 = vadd.f32 %v1571_v7, %v1524_v13  ;;  %v1811_v6 = vpop.f32.mrb[14].mxu0  ;;  %v1573_v30 = vpop.f32.mrb[7].mxu1  ;;  %v1600_v0 = vsel %vm2830_vm11, %v1569_v21, 0.0 }
 0x321   : > { %v1812_v61 = vpop.f32.mrb[15].mxu0  ;;  %1601 = vadd.xlane.f32.xlu0 %v1600_v0  ;;  %v1614_v32 = vmul.f32 %v1569_v21, %v1569_v21 }
 0x322   : > { %v1752_v1 = vpack.c.bf16 %v1572_v29, %v1572_v29  ;;  %v1603_v8 = vsel %vm2831_vm2, %v1572_v29, 0.0  ;;  %v1529_v63 = vadd.f32 %v1810_v28, %v1782_v53  ;;  %v1615_v4 = vmul.f32 %v1572_v29, %v1572_v29  ;;  %1596 = vst.msk [vmem:[%s2720_s12] sm:$0xf] %vm1595_vm8, %v1751_v3 }
 0x323   : > { %1604 = vadd.xlane.f32.xlu1 %v1603_v8  ;;  %v1617_v18 = vsel %vm2832_vm3, %v1614_v32, 0.0 }
 0x324   : > { %1597 = vst.msk [vmem:[%s2720_s12 + $0x4] sm:$0xf] %vm1595_vm8, %v1752_v1  ;;  %v1620_v15 = vsel %vm2833_vm5, %v1615_v4, 0.0 }
 0x325   : > { %v1576_v40 = vpop.f32.mrb[8].mxu1  ;;  %1618 = vadd.xlane.f32.xlu0 %v1617_v18 }
 0x326   : > { %v1577_v11 = vadd.f32 %v1576_v40, %v1529_v63  ;;  %v1578_v10 = vpop.f32.mrb[9].mxu1 }
 0x327   : > { %v1579_v9 = vpop.f32.mrb[10].mxu1  ;;  %1621 = vadd.xlane.f32.xlu1 %v1620_v15 }
 0x328   : > { %v1753_v17 = vpack.c.bf16 %v1577_v11, %v1577_v11  ;;  %v1580_v12 = vpop.f32.mrb[11].mxu1  ;;  %v1606_v14 = vsel %vm1595_vm8, %v1577_v11, 0.0  ;;  %v1616_v16 = vmul.f32 %v1577_v11, %v1577_v11 }
 0x329   : > { %1607 = vadd.xlane.f32.xlu0 %v1606_v14 }
 0x32a   : > { %1599 = vst.msk [vmem:[%s2720_s12 + $0x8] sm:$0x3] %vm1598_vm7, %v1753_v17  ;;  %v1623_v20 = vsel %vm1595_vm8, %v1616_v16, 0.0 }
 0x32d   : > { %1624 = vadd.xlane.f32.xlu0 %v1623_v20 }
 0x3ae   : > { %v1602_v33 = vpop.xlane.xlu0 %1601 }
 0x3af   : > { %1610 = vst.msk [vmem:[%s237_s26] sm:$0xff] %vm1609_vm14, %v1602_v33 }
 0x3b0   : > { %v1605_v35 = vpop.xlane.xlu1 %1604 }
 0x3b1   : > { %1611 = vst.msk [vmem:[%s237_s26 + $0x8] sm:$0xff] %vm1609_vm14, %v1605_v35 }
 0x3b2   : > { %v1619_v37 = vpop.xlane.xlu0 %1618 }
 0x3b3   : > { %1627 = vst.msk [vmem:[%s237_s26] sm:$0xff] %vm1626_vm6, %v1619_v37 }
 0x3b4   : > { %v1622_v22 = vpop.xlane.xlu1 %1621 }
 0x3b5   : > { %1628 = vst.msk [vmem:[%s237_s26 + $0x8] sm:$0xff] %vm1626_vm6, %v1622_v22 }
 0x3b6   : > { %v1608_v31 = vpop.xlane.xlu0 %1607 }
 0x3b7   : > { %1613 = vst.msk [vmem:[%s237_s26 + $0x10] sm:$0xf] %vm1612_vm0, %v1608_v31 }
 0x3ba   : > { %v1625_v23 = vpop.xlane.xlu0 %1624 }
 0x3bb   : > { %1630 = vst.msk [vmem:[%s237_s26 + $0x10] sm:$0xf] %vm1629_vm12, %v1625_v23 }
 0x3bc PF: > { %s16_s18 = sadd.s32 1, %s1908_s18  }
 0x3bd   : > { %p13_p4 = scmp.ge.s32.totalorder %s16_s18, 4  }
 0x3bf   :  { %15 = sbr.rel (!%p13_p4) target bundleno = 1 (0x1), region = 78 }

</bundles_post_ra>
